<compile_context>
chip_gen: v5e
topology: v5e:2x2
jax: 0.10.0
libtpu: 0.0.40
codegen_flags: <defaults>
</compile_context>

<pallas_src>
import math

import jax
import jax.numpy as jnp
from jax.experimental import pallas as pl
from jax.experimental.pallas import tpu as pltpu

P = 9            # number of input features (WBC dataset feature count, `p`)
DIM = 50         # hidden width `dim`
HIDDEN_LAYERS = 2
XPROJ_COLS = 2 * DIM + 1   # fused projection width: [W0 | W1x | W2x]


def _round_up(n, m):
    return ((n + m - 1) // m) * m


def _ann_kernel(x_ref, wx_ref, w1h_ref, w2h_ref, b0_ref, b1_ref, b2_ref, out_ref):
    """One batch tile of the skip-connection MLP (3 MXU dots per tile)."""
    mm_dtype = wx_ref.dtype
    x = x_ref[...].astype(mm_dtype)                                   # (TB, P)

    # Fused x projection: cols [0:DIM]=x@W0, [DIM:2DIM]=x@W1x, [2DIM:]=x@W2x
    xproj = jnp.dot(x, wx_ref[...], preferred_element_type=jnp.float32)

    # layer 0: sigmoid(x @ W0 + b0)                                   (TB, DIM)
    h = jax.nn.sigmoid(xproj[:, :DIM] + b0_ref[...])

    # hidden layer 1: sigmoid(cat(h, x) @ W1 + b1)                    (TB, DIM)
    h = jax.nn.sigmoid(
        jnp.dot(h.astype(mm_dtype), w1h_ref[...],
                preferred_element_type=jnp.float32)
        + xproj[:, DIM:2 * DIM] + b1_ref[...])

    # output layer: sigmoid(cat(h, x) @ W2 + b2)                      (TB, 1)
    out = jax.nn.sigmoid(
        jnp.dot(h.astype(mm_dtype), w2h_ref[...],
                preferred_element_type=jnp.float32)
        + xproj[:, 2 * DIM:] + b2_ref[...])

    out_ref[...] = out.astype(out_ref.dtype)


def neural_net_forward(x, params, *, block_b=2048, matmul_dtype=jnp.bfloat16):
    """Pallas forward pass of NeuralNet. x: (B, P) float32 -> (B, 1) float32."""
    (w0, b0, w1, b1, w2, b2) = params
    B = x.shape[0]

    # Split concat-weights into h-part / x-part; fuse all x-projections.
    w1h, w1x = w1[:DIM, :], w1[DIM:, :]
    w2h, w2x = w2[:DIM, :], w2[DIM:, :]
    wx = jnp.concatenate([w0, w1x, w2x], axis=1)          # (P, 2*DIM + 1)

    wx = wx.astype(matmul_dtype)
    w1h = w1h.astype(matmul_dtype)
    w2h = w2h.astype(matmul_dtype)

    # Batch tile: multiple of 8 (f32 sublane); weights stay resident per step.
    tb = max(8, min(_round_up(block_b, 8), _round_up(B, 8)))
    bp = _round_up(B, tb)
    if bp != B:
        x = jnp.pad(x, ((0, bp - B), (0, 0)))
    grid = (bp // tb,)

    def const_spec(arr):
        return pl.BlockSpec(arr.shape, lambda i: (0, 0))

    b0_2d = b0.reshape(1, DIM)
    b1_2d = b1.reshape(1, DIM)
    b2_2d = b2.reshape(1, 1)

    out = pl.pallas_call(
        _ann_kernel,
        out_shape=jax.ShapeDtypeStruct((bp, 1), jnp.float32),
        grid=grid,
        in_specs=[
            pl.BlockSpec((tb, P), lambda i: (i, 0)),       # x tiles
            const_spec(wx),                                # resident weights
            const_spec(w1h),
            const_spec(w2h),
            const_spec(b0_2d),
            const_spec(b1_2d),
            const_spec(b2_2d),
        ],
        out_specs=pl.BlockSpec((tb, 1), lambda i: (i, 0)),
        compiler_params=pltpu.CompilerParams(
            dimension_semantics=("parallel",)),
    )(x, wx, w1h, w2h, b0_2d, b1_2d, b2_2d)

    return out[:B]


def init_params(key):
    """Deterministic params mimicking nn.Linear's U(-1/sqrt(fan_in), 1/sqrt(fan_in))."""
    keys = jax.random.split(key, 6)

    def linear(kw, kb, fan_in, fan_out):
        bound = 1.0 / math.sqrt(fan_in)
        w = jax.random.uniform(kw, (fan_in, fan_out), jnp.float32, -bound, bound)
        b = jax.random.uniform(kb, (fan_out,), jnp.float32, -bound, bound)
        return w, b

    w0, b0 = linear(keys[0], keys[1], P, DIM)
    w1, b1 = linear(keys[2], keys[3], DIM + P, DIM)
    w2, b2 = linear(keys[4], keys[5], DIM + P, 1)
    return (w0, b0, w1, b1, w2, b2)


def reference_forward(x, params, matmul_dtype=jnp.float32):
    """Pure-JAX reference (matches the PyTorch forward when matmul_dtype=f32)."""
    (w0, b0, w1, b1, w2, b2) = params

    def mm(a, w):
        return jnp.dot(a.astype(matmul_dtype), w.astype(matmul_dtype),
                       preferred_element_type=jnp.float32)

    h = jax.nn.sigmoid(mm(x, w0) + b0)
    h = jax.nn.sigmoid(mm(jnp.concatenate([h, x], axis=1), w1) + b1)
    return jax.nn.sigmoid(mm(jnp.concatenate([h, x], axis=1), w2) + b2)


if __name__ == "__main__":
    key = jax.random.PRNGKey(0)
    k_param, k_x = jax.random.split(key)

    params = init_params(k_param)
    # Small demo batch that still exercises the grid (3 tiles of 128) and the
    # ragged-tail padding path.  Production use: large B, block_b=2048..8192.
    B = 300
    x = jax.random.normal(k_x, (B, P), dtype=jnp.float32)

    out = neural_net_forward(x, params, block_b=128)
    jax.block_until_ready(out)
    assert out.shape == (B, 1)

    # Tight check vs a pure-JAX reference using the same bf16-matmul /
    # f32-accumulate math as the kernel.
    ref_matched = reference_forward(x, params, matmul_dtype=jnp.bfloat16)
    assert jnp.allclose(out, ref_matched, atol=1e-3, rtol=1e-3), \
        "mismatch vs matched (bf16-matmul) reference"

    # Fidelity check vs the full-f32, PyTorch-equivalent forward.
    ref_f32 = reference_forward(x, params, matmul_dtype=jnp.float32)
    assert jnp.allclose(out, ref_f32, atol=2e-2, rtol=0.0), \
        "mismatch vs f32 reference"

    print("KERNEL_OK")
</pallas_src>

<mosaic_0001>
module attributes {stable_mosaic.version = 11 : i64} {
  func.func @_ann_kernel(%arg0: i32, %arg1: memref<128x9xf32, #tpu.memory_space<vmem>>, %arg2: memref<9x101xbf16, #tpu.memory_space<vmem>>, %arg3: memref<50x50xbf16, #tpu.memory_space<vmem>>, %arg4: memref<50x1xbf16, #tpu.memory_space<vmem>>, %arg5: memref<1x50xf32, #tpu.memory_space<vmem>>, %arg6: memref<1x50xf32, #tpu.memory_space<vmem>>, %arg7: memref<1x1xf32, #tpu.memory_space<vmem>>, %arg8: memref<128x1xf32, #tpu.memory_space<vmem>>) attributes {dimension_semantics = [#tpu.dimension_semantics<parallel>], iteration_bounds = array<i64: 3>, scalar_prefetch = 0 : i64, scratch_operands = 0 : i64, tpu.core_type = #tpu.core_type<tc>, window_params = [{transform_indices = @transform_0, window_bounds = array<i64: 128, 9>}, {pipeline_mode = #tpu.pipeline_mode<synchronous>, transform_indices = @transform_1, window_bounds = array<i64: 9, 101>}, {pipeline_mode = #tpu.pipeline_mode<synchronous>, transform_indices = @transform_2, window_bounds = array<i64: 50, 50>}, {pipeline_mode = #tpu.pipeline_mode<synchronous>, transform_indices = @transform_3, window_bounds = array<i64: 50, 1>}, {pipeline_mode = #tpu.pipeline_mode<synchronous>, transform_indices = @transform_4, window_bounds = array<i64: 1, 50>}, {pipeline_mode = #tpu.pipeline_mode<synchronous>, transform_indices = @transform_5, window_bounds = array<i64: 1, 50>}, {pipeline_mode = #tpu.pipeline_mode<synchronous>, transform_indices = @transform_6, window_bounds = array<i64: 1, 1>}, {transform_indices = @transform_7, window_bounds = array<i64: 128, 1>}]} {
    %c0 = arith.constant 0 : index
    %c0_0 = arith.constant 0 : index
    %0 = vector.load %arg1[%c0, %c0_0] : memref<128x9xf32, #tpu.memory_space<vmem>>, vector<128x9xf32>
    %1 = arith.truncf %0 : vector<128x9xf32> to vector<128x9xbf16>
    %c0_1 = arith.constant 0 : index
    %c0_2 = arith.constant 0 : index
    %2 = vector.load %arg2[%c0_1, %c0_2] : memref<9x101xbf16, #tpu.memory_space<vmem>>, vector<9x101xbf16>
    %cst = arith.constant dense<0.000000e+00> : vector<128x101xf32>
    %3 = tpu.matmul %1, %2, %cst {dimension_numbers = #tpu.dot_dimension_numbers<[1], [0], [0], [1], [0, 0, 1, 1], [], []>} : vector<128x9xbf16>, vector<9x101xbf16>, vector<128x101xf32> -> vector<128x101xf32>
    %4 = vector.extract_strided_slice %3 {offsets = [0, 0], sizes = [128, 50], strides = [1, 1]} : vector<128x101xf32> to vector<128x50xf32>
    %c0_3 = arith.constant 0 : index
    %c0_4 = arith.constant 0 : index
    %5 = vector.load %arg5[%c0_3, %c0_4] : memref<1x50xf32, #tpu.memory_space<vmem>>, vector<1x50xf32>
    %6 = vector.broadcast %5 : vector<1x50xf32> to vector<128x50xf32>
    %7 = arith.addf %4, %6 : vector<128x50xf32>
    %8 = arith.negf %7 : vector<128x50xf32>
    %9 = math.exp %8 : vector<128x50xf32>
    %cst_5 = arith.constant 1.000000e+00 : f32
    %10 = vector.broadcast %cst_5 : f32 to vector<128x50xf32>
    %11 = arith.addf %10, %9 : vector<128x50xf32>
    %12 = arith.divf %10, %11 : vector<128x50xf32>
    %13 = arith.truncf %12 : vector<128x50xf32> to vector<128x50xbf16>
    %c0_6 = arith.constant 0 : index
    %c0_7 = arith.constant 0 : index
    %14 = vector.load %arg3[%c0_6, %c0_7] : memref<50x50xbf16, #tpu.memory_space<vmem>>, vector<50x50xbf16>
    %cst_8 = arith.constant dense<0.000000e+00> : vector<128x50xf32>
    %15 = tpu.matmul %13, %14, %cst_8 {dimension_numbers = #tpu.dot_dimension_numbers<[1], [0], [0], [1], [0, 0, 1, 1], [], []>} : vector<128x50xbf16>, vector<50x50xbf16>, vector<128x50xf32> -> vector<128x50xf32>
    %16 = vector.extract_strided_slice %3 {offsets = [0, 50], sizes = [128, 50], strides = [1, 1]} : vector<128x101xf32> to vector<128x50xf32>
    %17 = arith.addf %15, %16 : vector<128x50xf32>
    %c0_9 = arith.constant 0 : index
    %c0_10 = arith.constant 0 : index
    %18 = vector.load %arg6[%c0_9, %c0_10] : memref<1x50xf32, #tpu.memory_space<vmem>>, vector<1x50xf32>
    %19 = vector.broadcast %18 : vector<1x50xf32> to vector<128x50xf32>
    %20 = arith.addf %17, %19 : vector<128x50xf32>
    %21 = arith.negf %20 : vector<128x50xf32>
    %22 = math.exp %21 : vector<128x50xf32>
    %cst_11 = arith.constant 1.000000e+00 : f32
    %23 = vector.broadcast %cst_11 : f32 to vector<128x50xf32>
    %24 = arith.addf %23, %22 : vector<128x50xf32>
    %25 = arith.divf %23, %24 : vector<128x50xf32>
    %26 = arith.truncf %25 : vector<128x50xf32> to vector<128x50xbf16>
    %c0_12 = arith.constant 0 : index
    %c0_13 = arith.constant 0 : index
    %27 = vector.load %arg4[%c0_12, %c0_13] : memref<50x1xbf16, #tpu.memory_space<vmem>>, vector<50x1xbf16>
    %cst_14 = arith.constant dense<0.000000e+00> : vector<128x1xf32>
    %28 = tpu.matmul %26, %27, %cst_14 {dimension_numbers = #tpu.dot_dimension_numbers<[1], [0], [0], [1], [0, 0, 1, 1], [], []>} : vector<128x50xbf16>, vector<50x1xbf16>, vector<128x1xf32> -> vector<128x1xf32>
    %29 = vector.extract_strided_slice %3 {offsets = [0, 100], sizes = [128, 1], strides = [1, 1]} : vector<128x101xf32> to vector<128x1xf32>
    %30 = arith.addf %28, %29 : vector<128x1xf32>
    %c0_15 = arith.constant 0 : index
    %c0_16 = arith.constant 0 : index
    %31 = vector.load %arg7[%c0_15, %c0_16] : memref<1x1xf32, #tpu.memory_space<vmem>>, vector<1x1xf32>
    %32 = vector.broadcast %31 : vector<1x1xf32> to vector<128x1xf32>
    %33 = arith.addf %30, %32 : vector<128x1xf32>
    %34 = arith.negf %33 : vector<128x1xf32>
    %35 = math.exp %34 : vector<128x1xf32>
    %cst_17 = arith.constant 1.000000e+00 : f32
    %36 = vector.broadcast %cst_17 : f32 to vector<128x1xf32>
    %37 = arith.addf %36, %35 : vector<128x1xf32>
    %38 = arith.divf %36, %37 : vector<128x1xf32>
    %c0_18 = arith.constant 0 : index
    %c0_19 = arith.constant 0 : index
    %39 = vector.load %arg8[%c0_18, %c0_19] : memref<128x1xf32, #tpu.memory_space<vmem>>, vector<128x1xf32>
    tpu.vector_store %arg8[%c0_18, %c0_19], %38 {strides = array<i32>} : memref<128x1xf32, #tpu.memory_space<vmem>>, vector<128x1xf32>,
    return
  }
  func.func @transform_0(%arg0: i32) -> (i32, i32) {
    %c0_i32 = arith.constant 0 : i32
    %c0_i32_0 = arith.constant 0 : i32
    return %arg0, %c0_i32 : i32, i32
  }
  func.func @transform_1(%arg0: i32) -> (i32, i32) {
    %c0_i32 = arith.constant 0 : i32
    %c0_i32_0 = arith.constant 0 : i32
    %c0_i32_1 = arith.constant 0 : i32
    return %c0_i32, %c0_i32_0 : i32, i32
  }
  func.func @transform_2(%arg0: i32) -> (i32, i32) {
    %c0_i32 = arith.constant 0 : i32
    %c0_i32_0 = arith.constant 0 : i32
    %c0_i32_1 = arith.constant 0 : i32
    return %c0_i32, %c0_i32_0 : i32, i32
  }
  func.func @transform_3(%arg0: i32) -> (i32, i32) {
    %c0_i32 = arith.constant 0 : i32
    %c0_i32_0 = arith.constant 0 : i32
    %c0_i32_1 = arith.constant 0 : i32
    return %c0_i32, %c0_i32_0 : i32, i32
  }
  func.func @transform_4(%arg0: i32) -> (i32, i32) {
    %c0_i32 = arith.constant 0 : i32
    %c0_i32_0 = arith.constant 0 : i32
    %c0_i32_1 = arith.constant 0 : i32
    return %c0_i32, %c0_i32_0 : i32, i32
  }
  func.func @transform_5(%arg0: i32) -> (i32, i32) {
    %c0_i32 = arith.constant 0 : i32
    %c0_i32_0 = arith.constant 0 : i32
    %c0_i32_1 = arith.constant 0 : i32
    return %c0_i32, %c0_i32_0 : i32, i32
  }
  func.func @transform_6(%arg0: i32) -> (i32, i32) {
    %c0_i32 = arith.constant 0 : i32
    %c0_i32_0 = arith.constant 0 : i32
    %c0_i32_1 = arith.constant 0 : i32
    return %c0_i32, %c0_i32_0 : i32, i32
  }
  func.func @transform_7(%arg0: i32) -> (i32, i32) {
    %c0_i32 = arith.constant 0 : i32
    %c0_i32_0 = arith.constant 0 : i32
    return %arg0, %c0_i32 : i32, i32
  }
}

</mosaic_0001>

<bundles_post_ra>
// kernel: tpu_custom_call.1
= control target key start
LH: loop header
LB: loop body
LE: loop exit
PB: predicated region body
PF: predicated region fallthrough
CT: control target
= control target key end

     0   :  { %s2167_s26 = smov 0   ;;  %s2694_s0 = inlined_call_operand.vmem [shape: f32[384,9], index: 0, kind: input, shape index: {}]   ;;  %s2695_s1 = inlined_call_operand.vmem [shape: bf16[9,101], index: 1, kind: input, shape index: {}]   ;;  %s2696_s2 = inlined_call_operand.vmem [shape: bf16[50,50], index: 2, kind: input, shape index: {}]   ;;  %s2697_s3 = inlined_call_operand.vmem [shape: bf16[50,1], index: 3, kind: input, shape index: {}]   ;;  %s2698_s4 = inlined_call_operand.vmem [shape: f32[1,50], index: 4, kind: input, shape index: {}]   ;;  %s2699_s5 = inlined_call_operand.vmem [shape: f32[1,50], index: 5, kind: input, shape index: {}]   ;;  %s2700_s6 = inlined_call_operand.<no memory space> [shape: f32[1,1], index: 6, kind: input, shape index: {}]   ;;  %s2701_s7 = inlined_call_operand.vmem [shape: f32[384,1], index: 7, kind: output, shape index: {}]  }
   0x1   :  { %v12_v0 = vstv %s2700_s6 }
   0x2   :  { %13 = vst [vmem:[#allocation2] sm:$0x1] %v12_v0 }
   0x3 LB: > { %s1780_s27 = sadd.s32 4294967295, %s2119_s26   ;;  %p1784_p0 = scmp.ge.s32.totalorder %s2119_s26, 1  ;;  %s2119_s26 = sphi %s2167_s26, %s19_s26  }
   0x4   : > { %p240_p1 = scmp.lt.s32.totalorder %s2119_s26, 4 }
   0x6   : > { %p241_p2 = pnand %p1784_p0, %p240_p1 }
   0x7   : > { %s1785_s8 = sshll.u32 (!%p241_p2), %s1780_s27, 4  ;;  %s2122_s21 = smov (!%p241_p2), 78  }
   0x8   : > { %244 = sbr.rel (%p241_p2) target bundleno = 647 (0x287), region = 48  ;;  %p273_p3 = scmp.lt.s32.totalorder (!%p241_p2), %s1785_s8, 47 }
   0x9   : > { %s2123_s24 = smov (!%p241_p2), 28  }
   0xd   : > { %v1791_v1 = vld [vmem:[%s2695_s1] sm:$0xf]  ;;  %v1891_v2 = vld [vmem:[%s2695_s1] sm:$0x10]  ;;  %vm341_vm0 = vcmask 1043456   ;;  %vm342_vm1 = vcmask 1044480  }
   0xe   : > { %v1792_v3 = vor.u32 %v1891_v2, %v1791_v1  ;;  %v2121_v4 = vmov 65535   ;;  %s2729_s8 = smov (!%p273_p3, %s1785_s8), 47  ;;  %vm316_vm2 = vcmask 72704   ;;  %v735_v32 = vld [vmem:[%s2696_s2 + $0x18] sm:$0x1]  ;;  %vm846_vm3 = vcmask 1040384  }
   0xf   : > { %v343_v5 = vsel %vm341_vm0, 4294967295, %v2121_v4  ;;  %s1786_s9 = sshll.u32 %s2729_s8, 3  ;;  %v749_v33 = vunpack.c.l.b16 %v735_v32  ;;  %v1894_v36 = vld [vmem:[%s2696_s2 + $0x10] sm:$0xff]  ;;  %v2225_v37 = vld [vmem:[%s2698_s4] ss:$0 sm:$0xff]  ;;  %v1893_v39 = vld [vmem:[%s2696_s2 + $0x8] sm:$0xff] }
  0x10   : > { %v344_v6 = vsel %vm342_vm1, %v343_v5, 0  ;;  %s2189_s12 = scalar_lea.vmem %s2694_s0, %s1786_s9  ;;  %v1892_v42 = vld [vmem:[%s2696_s2] sm:$0xff]  ;;  %vm821_vm12 = vcmask 408576   ;;  %s2645_s16 = scalar_lea.vmem %s2701_s7, %s1786_s9 }
  0x11   : > { %v346_v7 = vand.u32 %v1792_v3, %v344_v6  ;;  %v285_v8 = vld [vmem:[%s2189_s12] sm:$0xff]  ;;  %v286_v9 = vld [vmem:[%s2189_s12 + $0x8] sm:$0xff]  ;;  %v287_v11 = vld [vmem:[%s2189_s12 + $0x10] sm:$0xff]  ;;  %v753_v34 = vpack.c.b16 %v749_v33, %v749_v33 }
  0x12   : > { %v301_v10 = vpack.c.bf16 %v286_v9, %v285_v8  ;;  %v288_v12 = vld [vmem:[%s2189_s12 + $0x18] sm:$0xff]  ;;  %v289_v14 = vld [vmem:[%s2189_s12 + $0x20] sm:$0xff]  ;;  %v290_v15 = vld [vmem:[%s2189_s12 + $0x28] sm:$0xff] }
  0x13   : > { %355 = vmatpush.bf16.msra.mxu0 %v346_v7  ;;  %1898 = vmatpush.bf16.msra.mxu3 %v346_v7  ;;  %v302_v13 = vpack.c.bf16 %v288_v12, %v287_v11  ;;  %v303_v16 = vpack.c.bf16 %v290_v15, %v289_v14  ;;  %v299_v17 = vld [vmem:[%s2189_s12 + $0x70] sm:$0xff]  ;;  %v300_v18 = vld [vmem:[%s2189_s12 + $0x78] sm:$0xff]  ;;  %v293_v23 = vld [vmem:[%s2189_s12 + $0x40] sm:$0xff]  ;;  %v848_v35 = vsel %vm846_vm3, %v753_v34, 0 }
  0x14   : > { %v308_v19 = vpack.c.bf16 %v300_v18, %v299_v17  ;;  %v291_v20 = vld [vmem:[%s2189_s12 + $0x30] sm:$0xff]  ;;  %v292_v21 = vld [vmem:[%s2189_s12 + $0x38] sm:$0xff]  ;;  %v294_v24 = vld [vmem:[%s2189_s12 + $0x48] sm:$0xff]  ;;  %854 = vmatpush.bf16.msra.mxu1 %v848_v35 }
  0x15   : > { %v304_v22 = vpack.c.bf16 %v292_v21, %v291_v20  ;;  %v305_v25 = vpack.c.bf16 %v294_v24, %v293_v23  ;;  %v295_v26 = vld [vmem:[%s2189_s12 + $0x50] sm:$0xff]  ;;  %v296_v27 = vld [vmem:[%s2189_s12 + $0x58] sm:$0xff]  ;;  %v297_v29 = vld [vmem:[%s2189_s12 + $0x60] sm:$0xff] }
  0x16   : > { %1793 = vmatmul.msk.bf16.vlgmr.msra.gmra.mxu0 %vm316_vm2, %v301_v10  ;;  %1800 = vmatmul.msk.bf16.vlgmr.msra.gmra.mxu3 %vm316_vm2, %v308_v19  ;;  %v306_v28 = vpack.c.bf16 %v296_v27, %v295_v26  ;;  %v298_v30 = vld [vmem:[%s2189_s12 + $0x68] sm:$0xff] }
  0x17   : > { %v307_v31 = vpack.c.bf16 %v298_v30, %v297_v29  ;;  %1899 = vmatpush.bf16.msrb.mxu3 %v848_v35 }
  0x18   : > { %855 = vmatpush.bf16.msra.mxu1 %v1894_v36 }
  0x1b   : > { %1900 = vmatpush.bf16.msrb.mxu3 %v1894_v36 }
  0x1c   : > { %856 = vmatpush.bf16.msra.mxu1 %v1893_v39 }
  0x1f   : > { %1901 = vmatpush.bf16.msrb.mxu3 %v1893_v39 }
  0x20   : > { %857 = vmatpush.bf16.msra.mxu1 %v1892_v42 }
  0x23   : > { %1902 = vmatpush.bf16.msrb.mxu3 %v1892_v42 }
  0x26   : > { %1794 = vmatmul.msk.bf16.gmra.mxu0 %vm316_vm2, %v302_v13 }
  0x36   : > { %1795 = vmatmul.msk.bf16.gmra.mxu0 %vm316_vm2, %v303_v16 }
  0x46   : > { %1796 = vmatmul.msk.bf16.gmra.mxu0 %vm316_vm2, %v304_v22 }
  0x56   : > { %1797 = vmatmul.msk.bf16.gmra.mxu0 %vm316_vm2, %v305_v25 }
  0x66   : > { %1798 = vmatmul.msk.bf16.gmra.mxu0 %vm316_vm2, %v306_v28 }
  0x76   : > { %1799 = vmatmul.msk.bf16.gmra.mxu0 %vm316_vm2, %v307_v31 }
  0x93   : > { %v2227_v38 = vpop.f32.mrf.mxu0 }
  0x94   : > { %v401_v40 = vadd.f32 %v2225_v37, %v2227_v38  ;;  %773 = vrot.lane.b32.xlu0 %v2227_v38, %s2122_s21 }
  0x96   : > { %v1801_v41 = vmul.f32 -1.442695, %v401_v40 }
  0x98   : > { %1921 = vpow2.f32 %v1801_v41 }
  0x9b   : > { %v2239_v43 = vpop.f32.mrf.mxu0 }
  0x9c   : > { %v402_v44 = vadd.f32 %v2225_v37, %v2239_v43  ;;  %775 = vrot.lane.b32.xlu0 %v2239_v43, %s2122_s21 }
  0x9e   : > { %v1922_v45 = vpop.eup %1921  ;;  %v1802_v46 = vmul.f32 -1.442695, %v402_v44 }
  0x9f   : > { %v465_v47 = vadd.f32 1.0, %v1922_v45 }
  0xa0   : > { %1923 = vpow2.f32 %v1802_v46 }
  0xa1   : > { %1925 = vrcp.f32 %v465_v47  ;;  %vm486_vm5 = vweird.f32 %v465_v47  ;;  %v490_v3 = vand.u32 2147483647, %v465_v47  ;;  %v492_v4 = vand.u32 2147483648, %v465_v47 }
  0xa3   : > { %v2245_v48 = vpop.f32.mrf.mxu0  ;;  %vm491_vm9 = vcmp.eq.f32.partialorder %v490_v3, 8.507059e+37  ;;  %v493_v16 = vor.u32 1.1754944e-38, %v492_v4 }
  0xa4   : > { %v403_v49 = vadd.f32 %v2225_v37, %v2245_v48  ;;  %777 = vrot.lane.b32.xlu1 %v2245_v48, %s2122_s21 }
  0xa6   : > { %v1924_v50 = vpop.eup %1923  ;;  %v1803_v51 = vmul.f32 -1.442695, %v403_v49 }
  0xa7   : > { %v1926_v52 = vpop.eup %1925  ;;  %v466_v53 = vadd.f32 1.0, %v1924_v50 }
  0xa8   : > { %1927 = vpow2.f32 %v1803_v51  ;;  %v482_v54 = vmul.f32 %v1926_v52, %v465_v47  ;;  %vm487_vm4 = vweird.f32 %v1926_v52 }
  0xa9   : > { %1929 = vrcp.f32 %v466_v53  ;;  %v507_v5 = vand.u32 2147483648, %v466_v53  ;;  %v505_v8 = vand.u32 2147483647, %v466_v53  ;;  %vm2266_vm7 = vmor %vm486_vm5, %vm487_vm4  ;;  %vm501_vm8 = vweird.f32 %v466_v53 }
  0xaa   : > { %v483_v55 = vsub.f32 1.0, %v482_v54 }
  0xab   : > { %v2251_v56 = vpop.f32.mrf.mxu0  ;;  %v508_v17 = vor.u32 1.1754944e-38, %v507_v5  ;;  %vm506_vm11 = vcmp.eq.f32.partialorder %v505_v8, 8.507059e+37 }
  0xac   : > { %v404_v57 = vadd.f32 %v2225_v37, %v2251_v56  ;;  %779 = vrot.lane.b32.xlu1 %v2251_v56, %s2122_s21  ;;  %v484_v60 = vmul.f32 %v1926_v52, %v483_v55 }
  0xae   : > { %v1928_v58 = vpop.eup %1927  ;;  %v1804_v59 = vmul.f32 -1.442695, %v404_v57  ;;  %v485_v0 = vadd.f32 %v1926_v52, %v484_v60 }
  0xaf   : > { %v1930_v61 = vpop.eup %1929  ;;  %v2257_v62 = vadd.f32 1.0, %v1928_v58 }
  0xb0   : > { %1931 = vpow2.f32 %v1804_v59  ;;  %v497_v63 = vmul.f32 %v1930_v61, %v466_v53  ;;  %vm502_vm6 = vweird.f32 %v1930_v61  ;;  %v489_v12 = vsel %vm2266_vm7, %v1926_v52, %v485_v0 }
  0xb1   : > { %1933 = vrcp.f32 %v2257_v62  ;;  %vm503_vm10 = vmor %vm501_vm8, %vm502_vm6  ;;  %v494_v20 = vsel %vm491_vm9, %v493_v16, %v489_v12  ;;  %vm516_vm14 = vweird.f32 %v2257_v62  ;;  %v520_v35 = vand.u32 2147483647, %v2257_v62 }
  0xb2   : > { %v498_v1 = vsub.f32 1.0, %v497_v63  ;;  %v522_v36 = vand.u32 2147483648, %v2257_v62 }
  0xb3   : > { %v2260_v2 = vpop.f32.mrf.mxu0  ;;  %vm521_vm2 = vcmp.eq.f32.partialorder %v520_v35, 8.507059e+37 }
  0xb4   : > { %v405_v6 = vadd.f32 %v2225_v37, %v2260_v2  ;;  %781 = vrot.lane.b32.xlu2 %v2260_v2, %s2122_s21  ;;  %v499_v7 = vmul.f32 %v1930_v61, %v498_v1  ;;  %v523_v52 = vor.u32 1.1754944e-38, %v522_v36 }
  0xb6   : > { %v1932_v10 = vpop.eup %1931  ;;  %v1805_v11 = vmul.f32 -1.442695, %v405_v6  ;;  %v500_v13 = vadd.f32 %v1930_v61, %v499_v7 }
  0xb7   : > { %v1934_v14 = vpop.eup %1933  ;;  %v468_v15 = vadd.f32 1.0, %v1932_v10 }
  0xb8   : > { %1935 = vpow2.f32 %v1805_v11  ;;  %v504_v18 = vsel %vm503_vm10, %v1930_v61, %v500_v13  ;;  %v512_v19 = vmul.f32 %v1934_v14, %v2257_v62  ;;  %vm517_vm13 = vweird.f32 %v1934_v14 }
  0xb9   : > { %1937 = vrcp.f32 %v468_v15  ;;  %v509_v21 = vsel %vm506_vm11, %v508_v17, %v504_v18  ;;  %v537_v39 = vand.u32 2147483648, %v468_v15  ;;  %v535_v42 = vand.u32 2147483647, %v468_v15  ;;  %vm2292_vm0 = vmor %vm516_vm14, %vm517_vm13 }
  0xba   : > { %v721_v22 = vpack.c.bf16 %v509_v21, %v494_v20  ;;  %v513_v23 = vsub.f32 1.0, %v512_v19  ;;  %vm531_vm1 = vweird.f32 %v468_v15 }
  0xbb   : > { %v2273_v24 = vpop.f32.mrf.mxu0  ;;  %v538_v53 = vor.u32 1.1754944e-38, %v537_v39  ;;  %vm536_vm5 = vcmp.eq.f32.partialorder %v535_v42, 8.507059e+37 }
  0xbc   : > { %v406_v25 = vadd.f32 %v2225_v37, %v2273_v24  ;;  %1829 = vmatmul.msk.bf16.vlgmr.msra.gmra.mxu1 %vm821_vm12, %v721_v22  ;;  %783 = vrot.lane.b32.xlu2 %v2273_v24, %s2122_s21  ;;  %v514_v28 = vmul.f32 %v1934_v14, %v513_v23 }
  0xbe   : > { %v1936_v26 = vpop.eup %1935  ;;  %v1806_v27 = vmul.f32 -1.442695, %v406_v25  ;;  %v515_v32 = vadd.f32 %v1934_v14, %v514_v28 }
  0xbf   : > { %v1938_v29 = vpop.eup %1937  ;;  %v2280_v30 = vadd.f32 1.0, %v1936_v26 }
  0xc0   : > { %1939 = vpow2.f32 %v1806_v27  ;;  %v527_v31 = vmul.f32 %v1938_v29, %v468_v15  ;;  %vm532_vm15 = vweird.f32 %v1938_v29  ;;  %v519_v47 = vsel %vm2292_vm0, %v1934_v14, %v515_v32 }
  0xc1   : > { %1941 = vrcp.f32 %v2280_v30  ;;  %vm533_vm4 = vmor %vm531_vm1, %vm532_vm15  ;;  %v524_v57 = vsel %vm521_vm2, %v523_v52, %v519_v47  ;;  %vm546_vm7 = vweird.f32 %v2280_v30  ;;  %v550_v9 = vand.u32 2147483647, %v2280_v30 }
  0xc2   : > { %v528_v33 = vsub.f32 1.0, %v527_v31  ;;  %v552_v10 = vand.u32 2147483648, %v2280_v30 }
  0xc3   : > { %v2283_v34 = vpop.f32.mrf.mxu0  ;;  %vm551_vm11 = vcmp.eq.f32.partialorder %v550_v9, 8.507059e+37 }
  0xc4   : > { %v407_v40 = vadd.f32 %v2225_v37, %v2283_v34  ;;  %785 = vrot.lane.b32.xlu0 %v2283_v34, %s2122_s21  ;;  %v529_v41 = vmul.f32 %v1938_v29, %v528_v33  ;;  %v553_v22 = vor.u32 1.1754944e-38, %v552_v10 }
  0xc6   : > { %v1940_v45 = vpop.eup %1939  ;;  %v1807_v46 = vmul.f32 -1.442695, %v407_v40  ;;  %v530_v49 = vadd.f32 %v1938_v29, %v529_v41  ;;  %v2334_v41 = vpop.f32.mrf.mxu3 }
  0xc7   : > { %v1942_v50 = vpop.eup %1941  ;;  %v470_v51 = vadd.f32 1.0, %v1940_v45 }
  0xc8   : > { %1943 = vpow2.f32 %v1807_v46  ;;  %v534_v54 = vsel %vm533_vm4, %v1938_v29, %v530_v49  ;;  %v542_v55 = vmul.f32 %v1942_v50, %v2280_v30  ;;  %vm547_vm6 = vweird.f32 %v1942_v50 }
  0xc9   : > { %1945 = vrcp.f32 %v470_v51  ;;  %v539_v58 = vsel %vm536_vm5, %v538_v53, %v534_v54  ;;  %v567_v11 = vand.u32 2147483648, %v470_v51  ;;  %v565_v14 = vand.u32 2147483647, %v470_v51  ;;  %vm2318_vm9 = vmor %vm546_vm7, %vm547_vm6 }
  0xca   : > { %v722_v59 = vpack.c.bf16 %v539_v58, %v524_v57  ;;  %v543_v60 = vsub.f32 1.0, %v542_v55  ;;  %vm561_vm10 = vweird.f32 %v470_v51 }
  0xcb   : > { %v2299_v61 = vpop.f32.mrf.mxu0  ;;  %v568_v23 = vor.u32 1.1754944e-38, %v567_v11  ;;  %vm566_vm14 = vcmp.eq.f32.partialorder %v565_v14, 8.507059e+37 }
  0xcc   : > { %v408_v62 = vadd.f32 %v2225_v37, %v2299_v61  ;;  %1830 = vmatmul.msk.bf16.gmra.mxu1 %vm821_vm12, %v722_v59  ;;  %787 = vrot.lane.b32.xlu1 %v2299_v61, %s2122_s21  ;;  %v544_v1 = vmul.f32 %v1942_v50, %v543_v60 }
  0xce   : > { %v1944_v63 = vpop.eup %1943  ;;  %v1808_v0 = vmul.f32 -1.442695, %v408_v62  ;;  %v545_v6 = vadd.f32 %v1942_v50, %v544_v1 }
  0xcf   : > { %v1946_v3 = vpop.eup %1945  ;;  %v2306_v4 = vadd.f32 1.0, %v1944_v63 }
  0xd0   : > { %1947 = vpow2.f32 %v1808_v0  ;;  %v557_v5 = vmul.f32 %v1946_v3, %v470_v51  ;;  %vm562_vm8 = vweird.f32 %v1946_v3  ;;  %v549_v18 = vsel %vm2318_vm9, %v1942_v50, %v545_v6 }
  0xd1   : > { %1949 = vrcp.f32 %v2306_v4  ;;  %vm563_vm13 = vmor %vm561_vm10, %vm562_vm8  ;;  %v554_v27 = vsel %vm551_vm11, %v553_v22, %v549_v18  ;;  %vm576_vm0 = vweird.f32 %v2306_v4  ;;  %v580_v47 = vand.u32 2147483647, %v2306_v4 }
  0xd2   : > { %v558_v7 = vsub.f32 1.0, %v557_v5  ;;  %v582_v49 = vand.u32 2147483648, %v2306_v4  ;;  %v415_v18 = vadd.f32 %v2225_v37, %v2334_v41 }
  0xd3   : > { %v2309_v8 = vpop.f32.mrf.mxu0  ;;  %vm581_vm5 = vcmp.eq.f32.partialorder %v580_v47, 8.507059e+37 }
  0xd4   : > { %v409_v12 = vadd.f32 %v2225_v37, %v2309_v8  ;;  %789 = vrot.lane.b32.xlu2 %v2309_v8, %s2122_s21  ;;  %v559_v13 = vmul.f32 %v1946_v3, %v558_v7  ;;  %v583_v63 = vor.u32 1.1754944e-38, %v582_v49 }
  0xd6   : > { %v1948_v16 = vpop.eup %1947  ;;  %v1809_v17 = vmul.f32 -1.442695, %v409_v12  ;;  %v560_v19 = vadd.f32 %v1946_v3, %v559_v13 }
  0xd7   : > { %v1950_v20 = vpop.eup %1949  ;;  %v472_v21 = vadd.f32 1.0, %v1948_v16 }
  0xd8   : > { %1951 = vpow2.f32 %v1809_v17  ;;  %v564_v25 = vsel %vm563_vm13, %v1946_v3, %v560_v19  ;;  %v572_v26 = vmul.f32 %v1950_v20, %v2306_v4  ;;  %vm577_vm15 = vweird.f32 %v1950_v20  ;;  %v2356_v4 = vpop.f32.mrf.mxu3 }
  0xd9   : > { %1953 = vrcp.f32 %v472_v21  ;;  %v569_v28 = vsel %vm566_vm14, %v568_v23, %v564_v25  ;;  %v597_v50 = vand.u32 2147483648, %v472_v21  ;;  %v595_v53 = vand.u32 2147483647, %v472_v21  ;;  %vm2346_vm2 = vmor %vm576_vm0, %vm577_vm15 }
  0xda   : > { %v723_v29 = vpack.c.bf16 %v569_v28, %v554_v27  ;;  %v573_v30 = vsub.f32 1.0, %v572_v26  ;;  %vm591_vm4 = vweird.f32 %v472_v21 }
  0xdb   : > { %v2325_v31 = vpop.f32.mrf.mxu0  ;;  %v598_v0 = vor.u32 1.1754944e-38, %v597_v50  ;;  %vm596_vm7 = vcmp.eq.f32.partialorder %v595_v53, 8.507059e+37 }
  0xdc   : > { %v410_v32 = vadd.f32 %v2225_v37, %v2325_v31  ;;  %1831 = vmatmul.msk.bf16.gmra.mxu1 %vm821_vm12, %v723_v29  ;;  %791 = vrot.lane.b32.xlu0 %v2325_v31, %s2122_s21  ;;  %v574_v36 = vmul.f32 %v1950_v20, %v573_v30  ;;  %v1815_v29 = vmul.f32 -1.442695, %v415_v18  ;;  %v416_v30 = vadd.f32 %v2225_v37, %v2356_v4 }
  0xde   : > { %v1952_v33 = vpop.eup %1951  ;;  %v1810_v35 = vmul.f32 -1.442695, %v410_v32  ;;  %v575_v44 = vadd.f32 %v1950_v20, %v574_v36  ;;  %v1816_v49 = vmul.f32 -1.442695, %v416_v30 }
  0xdf   : > { %v1954_v39 = vpop.eup %1953  ;;  %v2332_v40 = vadd.f32 1.0, %v1952_v33 }
  0xe0   : > { %1955 = vpow2.f32 %v1810_v35  ;;  %v587_v42 = vmul.f32 %v1954_v39, %v472_v21  ;;  %vm592_vm1 = vweird.f32 %v1954_v39  ;;  %v579_v58 = vsel %vm2346_vm2, %v1950_v20, %v575_v44 }
  0xe1   : > { %1957 = vrcp.f32 %v2332_v40  ;;  %vm593_vm6 = vmor %vm591_vm4, %vm592_vm1  ;;  %v584_v5 = vsel %vm581_vm5, %v583_v63, %v579_v58  ;;  %vm606_vm9 = vweird.f32 %v2332_v40  ;;  %v610_v22 = vand.u32 2147483647, %v2332_v40 }
  0xe2   : > { %v588_v45 = vsub.f32 1.0, %v587_v42  ;;  %v612_v23 = vand.u32 2147483648, %v2332_v40 }
  0xe3   : > { %v2337_v46 = vpop.f32.mrf.mxu0  ;;  %vm611_vm14 = vcmp.eq.f32.partialorder %v610_v22, 8.507059e+37 }
  0xe4   : > { %v411_v51 = vadd.f32 %v2225_v37, %v2337_v46  ;;  %793 = vrot.lane.b32.xlu0 %v2337_v46, %s2122_s21  ;;  %v589_v52 = vmul.f32 %v1954_v39, %v588_v45  ;;  %v613_v42 = vor.u32 1.1754944e-38, %v612_v23 }
  0xe6   : > { %v1956_v55 = vpop.eup %1955  ;;  %v1811_v57 = vmul.f32 -1.442695, %v411_v51  ;;  %v590_v59 = vadd.f32 %v1954_v39, %v589_v52 }
  0xe7   : > { %v2352_v60 = vpop.eup %1957  ;;  %v474_v62 = vadd.f32 1.0, %v1956_v55 }
  0xe8   : > { %1959 = vpow2.f32 %v1811_v57  ;;  %v594_v1 = vsel %vm593_vm6, %v1954_v39, %v590_v59  ;;  %v602_v3 = vmul.f32 %v2352_v60, %v2332_v40  ;;  %vm607_vm8 = vweird.f32 %v2352_v60 }
  0xe9   : > { %1961 = vrcp.f32 %v474_v62  ;;  %v599_v6 = vsel %vm596_vm7, %v598_v0, %v594_v1  ;;  %v627_v25 = vand.u32 2147483648, %v474_v62  ;;  %v625_v28 = vand.u32 2147483647, %v474_v62  ;;  %vm2388_vm11 = vmor %vm606_vm9, %vm607_vm8 }
  0xea   : > { %v724_v7 = vpack.c.bf16 %v599_v6, %v584_v5  ;;  %v603_v9 = vsub.f32 1.0, %v602_v3  ;;  %vm621_vm13 = vweird.f32 %v474_v62 }
  0xeb   : > { %v2358_v10 = vpop.f32.mrf.mxu0  ;;  %v628_v44 = vor.u32 1.1754944e-38, %v627_v25  ;;  %vm626_vm0 = vcmp.eq.f32.partialorder %v625_v28, 8.507059e+37 }
  0xec   : > { %v412_v11 = vadd.f32 %v2225_v37, %v2358_v10  ;;  %1832 = vmatmul.msk.bf16.gmra.mxu1 %vm821_vm12, %v724_v7  ;;  %803 = vrot.lane.b32.xlu0 %v2356_v4, %s2122_s21  ;;  %v604_v14 = vmul.f32 %v2352_v60, %v603_v9 }
  0xee   : > { %v1960_v12 = vpop.eup %1959  ;;  %v1812_v13 = vmul.f32 -1.442695, %v412_v11  ;;  %v605_v19 = vadd.f32 %v2352_v60, %v604_v14 }
  0xef   : > { %v1962_v15 = vpop.eup %1961  ;;  %v2366_v16 = vadd.f32 1.0, %v1960_v12  ;;  %v1896_v12 = vld [vmem:[%s2697_s3 + $0x8] sm:$0xff] }
  0xf0   : > { %1963 = vpow2.f32 %v1812_v13  ;;  %v617_v17 = vmul.f32 %v1962_v15, %v474_v62  ;;  %vm622_vm10 = vweird.f32 %v1962_v15 }
  0xf1   : > { %1965 = vrcp.f32 %v2366_v16  ;;  %vm623_vm15 = vmor %vm621_vm13, %vm622_vm10  ;;  %vm636_vm2 = vweird.f32 %v2366_v16  ;;  %v642_v5 = vand.u32 2147483648, %v2366_v16  ;;  %v640_v7 = vand.u32 2147483647, %v2366_v16 }
  0xf2   : > { %v618_v20 = vsub.f32 1.0, %v617_v17 }
  0xf3   : > { %v2373_v21 = vpop.f32.mrf.mxu0  ;;  %v643_v17 = vor.u32 1.1754944e-38, %v642_v5  ;;  %vm641_vm8 = vcmp.eq.f32.partialorder %v640_v7, 8.507059e+37  ;;  %v2498_v7 = vld [vmem:[%s2699_s5] ss:$0 sm:$0xff] }
  0xf4   : > { %v413_v26 = vadd.f32 %v2225_v37, %v2373_v21  ;;  %1263 = vrot.lane.b32.xlu0 %v2245_v48, %s2123_s24  ;;  %797 = vrot.lane.b32.xlu1 %v2373_v21, %s2122_s21  ;;  %v619_v27 = vmul.f32 %v1962_v15, %v618_v20  ;;  %v609_v48 = vsel %vm2388_vm11, %v2352_v60, %v605_v19 }
  0xf5   : > { %v614_v50 = vsel %vm611_vm14, %v613_v42, %v609_v48 }
  0xf6   : > { %v1964_v33 = vpop.eup %1963  ;;  %v1813_v35 = vmul.f32 -1.442695, %v413_v26  ;;  %v620_v36 = vadd.f32 %v1962_v15, %v619_v27 }
  0xf7   : > { %v2395_v39 = vpop.eup %1965  ;;  %v2397_v40 = vadd.f32 1.0, %v1964_v33 }
  0xf8   : > { %1967 = vpow2.f32 %v1813_v35  ;;  %v624_v45 = vsel %vm623_vm15, %v1962_v15, %v620_v36  ;;  %v632_v47 = vmul.f32 %v2395_v39, %v2366_v16  ;;  %vm637_vm1 = vweird.f32 %v2395_v39 }
  0xf9   : > { %1969 = vrcp.f32 %v2397_v40  ;;  %v629_v51 = vsel %vm626_vm0, %v628_v44, %v624_v45  ;;  %v657_v6 = vand.u32 2147483648, %v2397_v40  ;;  %v655_v11 = vand.u32 2147483647, %v2397_v40  ;;  %vm2433_vm5 = vmor %vm636_vm2, %vm637_vm1 }
  0xfa   : > { %1971 = vpow2.f32 %v1815_v29  ;;  %v725_v52 = vpack.c.bf16 %v629_v51, %v614_v50  ;;  %v633_v53 = vsub.f32 1.0, %v632_v47  ;;  %vm651_vm6 = vweird.f32 %v2397_v40 }
  0xfb   : > { %v2402_v54 = vpop.f32.mrf.mxu0  ;;  %1973 = vpow2.f32 %v1816_v49  ;;  %v658_v18 = vor.u32 1.1754944e-38, %v657_v6  ;;  %vm656_vm9 = vcmp.eq.f32.partialorder %v655_v11, 8.507059e+37 }
  0xfc   : > { %v414_v55 = vadd.f32 %v2225_v37, %v2402_v54  ;;  %1833 = vmatmul.msk.bf16.gmra.mxu1 %vm821_vm12, %v725_v52  ;;  %1269 = vrot.lane.b32.xlu0 %v2273_v24, %s2123_s24  ;;  %v634_v59 = vmul.f32 %v2395_v39, %v633_v53 }
  0xfd   : > { %795 = vrot.lane.b32.xlu1 %v2358_v10, %s2122_s21  ;;  %799 = vrot.lane.b32.xlu2 %v2402_v54, %s2122_s21 }
  0xfe   : > { %v1968_v57 = vpop.eup %1967  ;;  %v1814_v58 = vmul.f32 -1.442695, %v414_v55  ;;  %v635_v24 = vadd.f32 %v2395_v39, %v634_v59 }
  0xff   : > { %v1970_v60 = vpop.eup %1969  ;;  %v2414_v62 = vadd.f32 1.0, %v1968_v57 }
 0x100   : > { %v1972_v37 = vpop.eup %1971  ;;  %1975 = vpow2.f32 %v1814_v58  ;;  %v647_v63 = vmul.f32 %v1970_v60, %v2397_v40  ;;  %vm652_vm4 = vweird.f32 %v1970_v60 }
 0x101   : > { %1977 = vrcp.f32 %v2414_v62  ;;  %v1974_v1 = vpop.eup %1973  ;;  %v2420_v3 = vadd.f32 1.0, %v1972_v37  ;;  %vm653_vm7 = vmor %vm651_vm6, %vm652_vm4  ;;  %vm666_vm11 = vweird.f32 %v2414_v62  ;;  %v672_v48 = vand.u32 2147483648, %v2414_v62 }
 0x102   : > { %v648_v0 = vsub.f32 1.0, %v647_v63  ;;  %v2437_v14 = vadd.f32 1.0, %v1974_v1 }
 0x103   : > { %1979 = vrcp.f32 %v2420_v3  ;;  %v673_v45 = vor.u32 1.1754944e-38, %v672_v48  ;;  %vm696_vm4 = vweird.f32 %v2420_v3  ;;  %v702_v55 = vand.u32 2147483648, %v2420_v3 }
 0x104   : > { %1275 = vrot.lane.b32.xlu0 %v2309_v8, %s2123_s24  ;;  %v649_v9 = vmul.f32 %v1970_v60, %v648_v0  ;;  %v639_v8 = vsel %vm2433_vm5, %v2395_v39, %v635_v24  ;;  %vm711_vm6 = vweird.f32 %v2437_v14  ;;  %v717_v57 = vand.u32 2147483648, %v2437_v14 }
 0x105   : > { %1259 = vrot.lane.b32.xlu1 %v2227_v38, %s2123_s24  ;;  %801 = vrot.lane.b32.xlu2 %v2334_v41, %s2122_s21  ;;  %v644_v22 = vsel %vm641_vm8, %v643_v17, %v639_v8  ;;  %v700_v59 = vand.u32 2147483647, %v2420_v3 }
 0x106   : > { %v1976_v13 = vpop.eup %1975  ;;  %v650_v15 = vadd.f32 %v1970_v60, %v649_v9 }
 0x107   : > { %v1978_v16 = vpop.eup %1977  ;;  %v478_v38 = vadd.f32 1.0, %v1976_v13 }
 0x108   : > { %v662_v19 = vmul.f32 %v1978_v16, %v2414_v62  ;;  %v654_v20 = vsel %vm653_vm7, %v1970_v60, %v650_v15  ;;  %vm667_vm10 = vweird.f32 %v1978_v16  ;;  %v715_v60 = vand.u32 2147483647, %v2437_v14  ;;  %v1895_v15 = vld [vmem:[%s2697_s3] sm:$0xff] }
 0x109   : > { %1981 = vrcp.f32 %v478_v38  ;;  %v659_v23 = vsel %vm656_vm9, %v658_v18, %v654_v20  ;;  %v2449_v27 = vpop.eup %1979  ;;  %v687_v36 = vand.u32 2147483648, %v478_v38  ;;  %v685_v40 = vand.u32 2147483647, %v478_v38  ;;  %vm668_vm14 = vmor %vm666_vm11, %vm667_vm10 }
 0x10a   : > { %1983 = vrcp.f32 %v2437_v14  ;;  %v726_v25 = vpack.c.bf16 %v659_v23, %v644_v22  ;;  %v663_v26 = vsub.f32 1.0, %v662_v19  ;;  %vm681_vm15 = vweird.f32 %v478_v38 }
 0x10b   : > { %v688_v47 = vor.u32 1.1754944e-38, %v687_v36  ;;  %vm686_vm2 = vcmp.eq.f32.partialorder %v685_v40, 8.507059e+37  ;;  %vm697_vm5 = vweird.f32 %v2449_v27  ;;  %vm701_vm10 = vcmp.eq.f32.partialorder %v700_v59, 8.507059e+37 }
 0x10c   : > { %1281 = vrot.lane.b32.xlu0 %v2358_v10, %s2123_s24  ;;  %1834 = vmatmul.msk.bf16.gmra.mxu1 %vm821_vm12, %v726_v25  ;;  %v664_v28 = vmul.f32 %v1978_v16, %v663_v26  ;;  %v692_v10 = vmul.f32 %v2449_v27, %v2420_v3  ;;  %vm698_vm8 = vmor %vm696_vm4, %vm697_vm5  ;;  %vm716_vm11 = vcmp.eq.f32.partialorder %v715_v60, 8.507059e+37  ;;  %v1237_v3 = vld [vmem:[%s2697_s3 + $0x18] sm:$0x1] }
 0x10d   : > { %1265 = vrot.lane.b32.xlu1 %v2251_v56, %s2123_s24  ;;  %1261 = vrot.lane.b32.xlu2 %v2239_v43, %s2123_s24  ;;  %v670_v43 = vand.u32 2147483647, %v2414_v62  ;;  %v718_v62 = vor.u32 1.1754944e-38, %v717_v57  ;;  %v1251_v5 = vunpack.c.l.b16 %v1237_v3 }
 0x10e   : > { %v665_v35 = vadd.f32 %v1978_v16, %v664_v28  ;;  %v693_v49 = vsub.f32 1.0, %v692_v10  ;;  %v782_v40 = vpop.permute.xlu2 %781 }
 0x10f   : > { %v1982_v29 = vpop.eup %1981  ;;  %vm671_vm1 = vcmp.eq.f32.partialorder %v670_v43, 8.507059e+37 }
 0x110   : > { %v1984_v30 = vpop.eup %1983  ;;  %v677_v32 = vmul.f32 %v1982_v29, %v478_v38  ;;  %vm682_vm13 = vweird.f32 %v1982_v29  ;;  %v669_v42 = vsel %vm668_vm14, %v1978_v16, %v665_v35 }
 0x111   : > { %v707_v56 = vmul.f32 %v1984_v30, %v2437_v14  ;;  %vm683_vm0 = vmor %vm681_vm15, %vm682_vm13  ;;  %v674_v51 = vsel %vm671_vm1, %v673_v45, %v669_v42  ;;  %vm712_vm7 = vweird.f32 %v1984_v30 }
 0x112   : > { %v678_v33 = vsub.f32 1.0, %v677_v32  ;;  %vm713_vm9 = vmor %vm711_vm6, %vm712_vm7 }
 0x113   : > { %v708_v50 = vsub.f32 1.0, %v707_v56 }
 0x114   : > { %1287 = vrot.lane.b32.xlu0 %v2334_v41, %s2123_s24  ;;  %v679_v39 = vmul.f32 %v1982_v29, %v678_v33 }
 0x115   : > { %1271 = vrot.lane.b32.xlu1 %v2283_v34, %s2123_s24  ;;  %1267 = vrot.lane.b32.xlu2 %v2260_v2, %s2123_s24  ;;  %v694_v34 = vmul.f32 %v2449_v27, %v693_v49  ;;  %v709_v2 = vmul.f32 %v1984_v30, %v708_v50 }
 0x116   : > { %v680_v44 = vadd.f32 %v1982_v29, %v679_v39  ;;  %v778_v19 = vpop.permute.xlu1 %777 }
 0x117   : > { %v695_v58 = vadd.f32 %v2449_v27, %v694_v34 }
 0x118   : > { %v684_v41 = vsel %vm683_vm0, %v1982_v29, %v680_v44 }
 0x119   : > { %v689_v52 = vsel %vm686_vm2, %v688_v47, %v684_v41  ;;  %v699_v37 = vsel %vm698_vm8, %v2449_v27, %v695_v58 }
 0x11a   : > { %v727_v53 = vpack.c.bf16 %v689_v52, %v674_v51 }
 0x11c   : > { %1835 = vmatmul.msk.bf16.vlgmr.msrb.gmra.mxu3 %vm821_vm12, %v727_v53 }
 0x11d   : > { %1277 = vrot.lane.b32.xlu1 %v2325_v31, %s2123_s24  ;;  %1273 = vrot.lane.b32.xlu2 %v2299_v61, %s2123_s24  ;;  %v710_v31 = vadd.f32 %v1984_v30, %v709_v2  ;;  %v703_v61 = vor.u32 1.1754944e-38, %v702_v55 }
 0x11e   : > { %v780_v32 = vpop.permute.xlu1 %779 }
 0x11f   : > { %v714_v63 = vsel %vm713_vm9, %v1984_v30, %v710_v31  ;;  %v704_v24 = vsel %vm701_vm10, %v703_v61, %v699_v37 }
 0x120   : > { %v719_v0 = vsel %vm716_vm11, %v718_v62, %v714_v63 }
 0x121   : > { %v728_v1 = vpack.c.bf16 %v719_v0, %v704_v24  ;;  %v784_v0 = vpop.permute.xlu2 %783 }
 0x125   : > { %1283 = vrot.lane.b32.xlu1 %v2373_v21, %s2123_s24  ;;  %1279 = vrot.lane.b32.xlu2 %v2337_v46, %s2123_s24  ;;  %v1255_v21 = vpack.c.b16 %v1251_v5, %v1251_v5  ;;  %v774_v46 = vpop.permute.xlu0 %773 }
 0x127   : > { %v1332_v6 = vsel %vm846_vm3, %v1255_v21, 0 }
 0x128   : > { %1338 = vmatpush.bf16.msra.mxu2 %v1332_v6  ;;  %1903 = vmatpush.bf16.msra.mxu3 %v1332_v6 }
 0x12c   : > { %1836 = vmatmul.msk.bf16.gmra.mxu3 %vm821_vm12, %v728_v1 }
 0x12d   : > { %1289 = vrot.lane.b32.xlu1 %v2356_v4, %s2123_s24  ;;  %1285 = vrot.lane.b32.xlu2 %v2402_v54, %s2123_s24  ;;  %v1897_v54 = vld [vmem:[%s2697_s3 + $0x10] sm:$0xff]  ;;  %v776_v14 = vpop.permute.xlu0 %775 }
 0x12e   : > { %1339 = vmatpush.bf16.msra.mxu2 %v1897_v54  ;;  %1904 = vmatpush.bf16.msra.mxu3 %v1897_v54 }
 0x132   : > { %1340 = vmatpush.bf16.msra.mxu2 %v1896_v12  ;;  %1905 = vmatpush.bf16.msra.mxu3 %v1896_v12 }
 0x136   : > { %1341 = vmatpush.bf16.msra.mxu2 %v1895_v15  ;;  %1906 = vmatpush.bf16.msra.mxu3 %v1895_v15 }
 0x139   : > { %v859_v4 = vpop.f32.mrf.mxu1 }
 0x13a   : > { %v860_v9 = vadd.f32 %v859_v4, %v774_v46 }
 0x13c   : > { %v903_v11 = vadd.f32 %v2498_v7, %v860_v9 }
 0x13e   : > { %v1837_v13 = vmul.f32 -1.442695, %v903_v11 }
 0x140   : > { %1985 = vpow2.f32 %v1837_v13 }
 0x141   : > { %v861_v8 = vpop.f32.mrf.mxu1 }
 0x142   : > { %v862_v16 = vadd.f32 %v861_v8, %v776_v14  ;;  %v786_v8 = vpop.permute.xlu0 %785 }
 0x144   : > { %v904_v38 = vadd.f32 %v2498_v7, %v862_v16 }
 0x146   : > { %v1986_v17 = vpop.eup %1985  ;;  %v1838_v18 = vmul.f32 -1.442695, %v904_v38 }
 0x147   : > { %v967_v20 = vadd.f32 1.0, %v1986_v17 }
 0x148   : > { %1987 = vpow2.f32 %v1838_v18 }
 0x149   : > { %1989 = vrcp.f32 %v967_v20  ;;  %v864_v22 = vpop.f32.mrf.mxu1  ;;  %vm988_vm13 = vweird.f32 %v967_v20  ;;  %v992_v50 = vand.u32 2147483647, %v967_v20  ;;  %v994_v51 = vand.u32 2147483648, %v967_v20 }
 0x14a   : > { %v865_v23 = vadd.f32 %v864_v22, %v778_v19 }
 0x14b   : > { %vm993_vm1 = vcmp.eq.f32.partialorder %v992_v50, 8.507059e+37  ;;  %v995_v62 = vor.u32 1.1754944e-38, %v994_v51 }
 0x14c   : > { %v905_v25 = vadd.f32 %v2498_v7, %v865_v23 }
 0x14e   : > { %v1988_v26 = vpop.eup %1987  ;;  %v1839_v27 = vmul.f32 -1.442695, %v905_v25 }
 0x14f   : > { %v1990_v28 = vpop.eup %1989  ;;  %v968_v29 = vadd.f32 1.0, %v1988_v26 }
 0x150   : > { %1991 = vpow2.f32 %v1839_v27  ;;  %v984_v30 = vmul.f32 %v1990_v28, %v967_v20  ;;  %vm989_vm3 = vweird.f32 %v1990_v28 }
 0x151   : > { %1993 = vrcp.f32 %v968_v29  ;;  %v866_v33 = vpop.f32.mrf.mxu1  ;;  %v1009_v52 = vand.u32 2147483648, %v968_v29  ;;  %v1007_v2 = vand.u32 2147483647, %v968_v29  ;;  %vm2517_vm15 = vmor %vm988_vm13, %vm989_vm3  ;;  %vm1003_vm0 = vweird.f32 %v968_v29 }
 0x152   : > { %v867_v35 = vadd.f32 %v866_v33, %v780_v32  ;;  %v985_v10 = vsub.f32 1.0, %v984_v30 }
 0x153   : > { %v1010_v37 = vor.u32 1.1754944e-38, %v1009_v52  ;;  %vm1008_vm4 = vcmp.eq.f32.partialorder %v1007_v2, 8.507059e+37 }
 0x154   : > { %v906_v48 = vadd.f32 %v2498_v7, %v867_v35  ;;  %v986_v43 = vmul.f32 %v1990_v28, %v985_v10 }
 0x156   : > { %v1992_v36 = vpop.eup %1991  ;;  %v1840_v56 = vmul.f32 -1.442695, %v906_v48  ;;  %v987_v49 = vadd.f32 %v1990_v28, %v986_v43 }
 0x157   : > { %v1994_v39 = vpop.eup %1993  ;;  %v2513_v42 = vadd.f32 1.0, %v1992_v36 }
 0x158   : > { %1995 = vpow2.f32 %v1840_v56  ;;  %v999_v44 = vmul.f32 %v1994_v39, %v968_v29  ;;  %vm1004_vm14 = vweird.f32 %v1994_v39  ;;  %v991_v59 = vsel %vm2517_vm15, %v1990_v28, %v987_v49  ;;  %v788_v56 = vpop.permute.xlu1 %787 }
 0x159   : > { %1997 = vrcp.f32 %v2513_v42  ;;  %v869_v45 = vpop.f32.mrf.mxu1  ;;  %vm1005_vm2 = vmor %vm1003_vm0, %vm1004_vm14  ;;  %v996_v3 = vsel %vm993_vm1, %v995_v62, %v991_v59  ;;  %vm1018_vm6 = vweird.f32 %v2513_v42  ;;  %v1022_v18 = vand.u32 2147483647, %v2513_v42 }
 0x15a   : > { %v870_v47 = vadd.f32 %v869_v45, %v782_v40  ;;  %v1000_v41 = vsub.f32 1.0, %v999_v44  ;;  %v1024_v19 = vand.u32 2147483648, %v2513_v42 }
 0x15b   : > { %vm1023_vm10 = vcmp.eq.f32.partialorder %v1022_v18, 8.507059e+37 }
 0x15c   : > { %v907_v53 = vadd.f32 %v2498_v7, %v870_v47  ;;  %v1001_v34 = vmul.f32 %v1994_v39, %v1000_v41  ;;  %v1025_v35 = vor.u32 1.1754944e-38, %v1024_v19 }
 0x15e   : > { %v1996_v57 = vpop.eup %1995  ;;  %v1841_v58 = vmul.f32 -1.442695, %v907_v53  ;;  %v1002_v31 = vadd.f32 %v1994_v39, %v1001_v34  ;;  %v790_v34 = vpop.permute.xlu2 %789 }
 0x15f   : > { %v2523_v60 = vpop.eup %1997  ;;  %v970_v61 = vadd.f32 1.0, %v1996_v57 }
 0x160   : > { %1999 = vpow2.f32 %v1841_v58  ;;  %v1006_v63 = vsel %vm1005_vm2, %v1994_v39, %v1002_v31  ;;  %v1014_v24 = vmul.f32 %v2523_v60, %v2513_v42  ;;  %vm1019_vm5 = vweird.f32 %v2523_v60 }
 0x161   : > { %2001 = vrcp.f32 %v970_v61  ;;  %v871_v1 = vpop.f32.mrf.mxu1  ;;  %v1011_v5 = vsel %vm1008_vm4, %v1010_v37, %v1006_v63  ;;  %v1039_v20 = vand.u32 2147483648, %v970_v61  ;;  %v1037_v25 = vand.u32 2147483647, %v970_v61  ;;  %vm2539_vm8 = vmor %vm1018_vm6, %vm1019_vm5 }
 0x162   : > { %v872_v21 = vadd.f32 %v871_v1, %v784_v0  ;;  %v1223_v6 = vpack.c.bf16 %v1011_v5, %v996_v3  ;;  %v1015_v46 = vsub.f32 1.0, %v1014_v24  ;;  %vm1033_vm9 = vweird.f32 %v970_v61 }
 0x163   : > { %v1040_v10 = vor.u32 1.1754944e-38, %v1039_v20  ;;  %vm1038_vm3 = vcmp.eq.f32.partialorder %v1037_v25, 8.507059e+37 }
 0x164   : > { %v908_v4 = vadd.f32 %v2498_v7, %v872_v21  ;;  %1865 = vmatmul.msk.bf16.vlgmr.msra.gmra.mxu2 %vm821_vm12, %v1223_v6  ;;  %v1016_v11 = vmul.f32 %v2523_v60, %v1015_v46  ;;  %v792_v21 = vpop.permute.xlu0 %791 }
 0x166   : > { %v2000_v54 = vpop.eup %1999  ;;  %v1842_v9 = vmul.f32 -1.442695, %v908_v4  ;;  %v1017_v38 = vadd.f32 %v2523_v60, %v1016_v11  ;;  %v2576_v20 = vpop.permute.xlu1 %797 }
 0x167   : > { %v2002_v12 = vpop.eup %2001  ;;  %v2530_v13 = vadd.f32 1.0, %v2000_v54 }
 0x168   : > { %2003 = vpow2.f32 %v1842_v9  ;;  %v1029_v14 = vmul.f32 %v2002_v12, %v970_v61  ;;  %vm1034_vm7 = vweird.f32 %v2002_v12  ;;  %v1021_v29 = vsel %vm2539_vm8, %v2523_v60, %v1017_v38 }
 0x169   : > { %2005 = vrcp.f32 %v2530_v13  ;;  %v874_v15 = vpop.f32.mrf.mxu1  ;;  %vm1035_vm11 = vmor %vm1033_vm9, %vm1034_vm7  ;;  %v1026_v39 = vsel %vm1023_vm10, %v1025_v35, %v1021_v29  ;;  %vm1048_vm14 = vweird.f32 %v2530_v13  ;;  %v1052_v59 = vand.u32 2147483647, %v2530_v13 }
 0x16a   : > { %v875_v16 = vadd.f32 %v874_v15, %v786_v8  ;;  %v1030_v17 = vsub.f32 1.0, %v1029_v14  ;;  %v1054_v31 = vand.u32 2147483648, %v2530_v13 }
 0x16b   : > { %vm1053_vm2 = vcmp.eq.f32.partialorder %v1052_v59, 8.507059e+37 }
 0x16c   : > { %v909_v22 = vadd.f32 %v2498_v7, %v875_v16  ;;  %v1031_v23 = vmul.f32 %v2002_v12, %v1030_v17  ;;  %v1055_v46 = vor.u32 1.1754944e-38, %v1054_v31  ;;  %v794_v25 = vpop.permute.xlu0 %793 }
 0x16e   : > { %v2004_v27 = vpop.eup %2003  ;;  %v1843_v28 = vmul.f32 -1.442695, %v909_v22  ;;  %v1032_v30 = vadd.f32 %v2002_v12, %v1031_v23 }
 0x16f   : > { %v2546_v32 = vpop.eup %2005  ;;  %v972_v33 = vadd.f32 1.0, %v2004_v27 }
 0x170   : > { %2007 = vpow2.f32 %v1843_v28  ;;  %v1036_v48 = vsel %vm1035_vm11, %v2002_v12, %v1032_v30  ;;  %v1044_v36 = vmul.f32 %v2546_v32, %v2530_v13  ;;  %vm1049_vm13 = vweird.f32 %v2546_v32 }
 0x171   : > { %2009 = vrcp.f32 %v972_v33  ;;  %v876_v43 = vpop.f32.mrf.mxu1  ;;  %v1041_v40 = vsel %vm1038_vm3, %v1040_v10, %v1036_v48  ;;  %v1069_v60 = vand.u32 2147483648, %v972_v33  ;;  %v1067_v37 = vand.u32 2147483647, %v972_v33  ;;  %vm2562_vm0 = vmor %vm1048_vm14, %vm1049_vm13 }
 0x172   : > { %v877_v42 = vadd.f32 %v876_v43, %v788_v56  ;;  %v1224_v44 = vpack.c.bf16 %v1041_v40, %v1026_v39  ;;  %v1045_v45 = vsub.f32 1.0, %v1044_v36  ;;  %vm1063_vm1 = vweird.f32 %v972_v33 }
 0x173   : > { %v1070_v4 = vor.u32 1.1754944e-38, %v1069_v60  ;;  %vm1068_vm5 = vcmp.eq.f32.partialorder %v1067_v37, 8.507059e+37 }
 0x174   : > { %v910_v47 = vadd.f32 %v2498_v7, %v877_v42  ;;  %1866 = vmatmul.msk.bf16.gmra.mxu2 %vm821_vm12, %v1224_v44  ;;  %v1046_v50 = vmul.f32 %v2546_v32, %v1045_v45 }
 0x176   : > { %v2008_v49 = vpop.eup %2007  ;;  %v1844_v41 = vmul.f32 -1.442695, %v910_v47  ;;  %v1047_v57 = vadd.f32 %v2546_v32, %v1046_v50  ;;  %v796_v50 = vpop.permute.xlu1 %795 }
 0x177   : > { %v2010_v51 = vpop.eup %2009  ;;  %v2553_v52 = vadd.f32 1.0, %v2008_v49 }
 0x178   : > { %2011 = vpow2.f32 %v1844_v41  ;;  %v1059_v53 = vmul.f32 %v2010_v51, %v972_v33  ;;  %vm1064_vm15 = vweird.f32 %v2010_v51  ;;  %v1051_v1 = vsel %vm2562_vm0, %v2546_v32, %v1047_v57 }
 0x179   : > { %2013 = vrcp.f32 %v2553_v52  ;;  %v879_v2 = vpop.f32.mrf.mxu1  ;;  %vm1065_vm4 = vmor %vm1063_vm1, %vm1064_vm15  ;;  %v1056_v12 = vsel %vm1053_vm2, %v1055_v46, %v1051_v1  ;;  %vm1078_vm7 = vweird.f32 %v2553_v52  ;;  %v1082_v30 = vand.u32 2147483647, %v2553_v52 }
 0x17a   : > { %v880_v55 = vadd.f32 %v879_v2, %v790_v34  ;;  %v1060_v58 = vsub.f32 1.0, %v1059_v53  ;;  %v1084_v32 = vand.u32 2147483648, %v2553_v52 }
 0x17b   : > { %vm1083_vm11 = vcmp.eq.f32.partialorder %v1082_v30, 8.507059e+37 }
 0x17c   : > { %v911_v61 = vadd.f32 %v2498_v7, %v880_v55  ;;  %v1061_v62 = vmul.f32 %v2010_v51, %v1060_v58  ;;  %v1085_v45 = vor.u32 1.1754944e-38, %v1084_v32 }
 0x17e   : > { %v2012_v24 = vpop.eup %2011  ;;  %v1845_v0 = vmul.f32 -1.442695, %v911_v61  ;;  %v1062_v3 = vadd.f32 %v2010_v51, %v1061_v62 }
 0x17f   : > { %v2569_v5 = vpop.eup %2013  ;;  %v974_v6 = vadd.f32 1.0, %v2012_v24 }
 0x180   : > { %2015 = vpow2.f32 %v1845_v0  ;;  %v1066_v54 = vsel %vm1065_vm4, %v2010_v51, %v1062_v3  ;;  %v1074_v9 = vmul.f32 %v2569_v5, %v2553_v52  ;;  %vm1079_vm6 = vweird.f32 %v2569_v5 }
 0x181   : > { %2017 = vrcp.f32 %v974_v6  ;;  %v881_v11 = vpop.f32.mrf.mxu1  ;;  %v1071_v13 = vsel %vm1068_vm5, %v1070_v4, %v1066_v54  ;;  %v1099_v33 = vand.u32 2147483648, %v974_v6  ;;  %v1097_v48 = vand.u32 2147483647, %v974_v6  ;;  %vm2587_vm9 = vmor %vm1078_vm7, %vm1079_vm6 }
 0x182   : > { %v882_v14 = vadd.f32 %v881_v11, %v792_v21  ;;  %v1225_v8 = vpack.c.bf16 %v1071_v13, %v1056_v12  ;;  %v1075_v15 = vsub.f32 1.0, %v1074_v9  ;;  %vm1093_vm10 = vweird.f32 %v974_v6 }
 0x183   : > { %v1100_v47 = vor.u32 1.1754944e-38, %v1099_v33  ;;  %vm1098_vm13 = vcmp.eq.f32.partialorder %v1097_v48, 8.507059e+37 }
 0x184   : > { %v912_v16 = vadd.f32 %v2498_v7, %v882_v14  ;;  %1867 = vmatmul.msk.bf16.gmra.mxu2 %vm821_vm12, %v1225_v8  ;;  %v1076_v18 = vmul.f32 %v2569_v5, %v1075_v15 }
 0x186   : > { %v2016_v38 = vpop.eup %2015  ;;  %v1846_v17 = vmul.f32 -1.442695, %v912_v16  ;;  %v1077_v28 = vadd.f32 %v2569_v5, %v1076_v18 }
 0x187   : > { %v2018_v19 = vpop.eup %2017  ;;  %v2578_v22 = vadd.f32 1.0, %v2016_v38 }
 0x188   : > { %2019 = vpow2.f32 %v1846_v17  ;;  %v1089_v23 = vmul.f32 %v2018_v19, %v974_v6  ;;  %vm1094_vm8 = vweird.f32 %v2018_v19  ;;  %v1081_v39 = vsel %vm2587_vm9, %v2569_v5, %v1077_v28 }
 0x189   : > { %2021 = vrcp.f32 %v2578_v22  ;;  %v884_v26 = vpop.f32.mrf.mxu1  ;;  %vm1095_vm3 = vmor %vm1093_vm10, %vm1094_vm8  ;;  %v1086_v52 = vsel %vm1083_vm11, %v1085_v45, %v1081_v39  ;;  %v1112_v24 = vand.u32 2147483647, %v2578_v22  ;;  %v1114_v0 = vand.u32 2147483648, %v2578_v22 }
 0x18a   : > { %v885_v27 = vadd.f32 %v884_v26, %v794_v25  ;;  %v1090_v29 = vsub.f32 1.0, %v1089_v23  ;;  %vm1108_vm15 = vweird.f32 %v2578_v22  ;;  %v800_v23 = vpop.permute.xlu2 %799 }
 0x18b   : > { %vm1113_vm4 = vcmp.eq.f32.partialorder %v1112_v24, 8.507059e+37  ;;  %v1115_v12 = vor.u32 1.1754944e-38, %v1114_v0 }
 0x18c   : > { %v913_v35 = vadd.f32 %v2498_v7, %v885_v27  ;;  %v1091_v10 = vmul.f32 %v2018_v19, %v1090_v29 }
 0x18e   : > { %v2020_v56 = vpop.eup %2019  ;;  %v1847_v43 = vmul.f32 -1.442695, %v913_v35  ;;  %v1092_v40 = vadd.f32 %v2018_v19, %v1091_v10 }
 0x18f   : > { %v2022_v42 = vpop.eup %2021  ;;  %v976_v44 = vadd.f32 1.0, %v2020_v56 }
 0x190   : > { %2023 = vpow2.f32 %v1847_v43  ;;  %v1096_v49 = vsel %vm1095_vm3, %v2018_v19, %v1092_v40  ;;  %v1104_v41 = vmul.f32 %v2022_v42, %v2578_v22  ;;  %vm1109_vm14 = vweird.f32 %v2022_v42 }
 0x191   : > { %2025 = vrcp.f32 %v976_v44  ;;  %v886_v51 = vpop.f32.mrf.mxu1  ;;  %v1101_v53 = vsel %vm1098_vm13, %v1100_v47, %v1096_v49  ;;  %v1129_v1 = vand.u32 2147483648, %v976_v44  ;;  %v1127_v5 = vand.u32 2147483647, %v976_v44  ;;  %vm2603_vm1 = vmor %vm1108_vm15, %vm1109_vm14 }
 0x192   : > { %v887_v34 = vadd.f32 %v886_v51, %v796_v50  ;;  %v1226_v2 = vpack.c.bf16 %v1101_v53, %v1086_v52  ;;  %v1105_v55 = vsub.f32 1.0, %v1104_v41  ;;  %vm1123_vm2 = vweird.f32 %v976_v44  ;;  %v802_v45 = vpop.permute.xlu2 %801 }
 0x193   : > { %v1130_v13 = vor.u32 1.1754944e-38, %v1129_v1  ;;  %vm1128_vm6 = vcmp.eq.f32.partialorder %v1127_v5, 8.507059e+37 }
 0x194   : > { %v914_v57 = vadd.f32 %v2498_v7, %v887_v34  ;;  %1868 = vmatmul.msk.bf16.gmra.mxu2 %vm821_vm12, %v1226_v2  ;;  %v1106_v31 = vmul.f32 %v2022_v42, %v1105_v55 }
 0x196   : > { %v2024_v58 = vpop.eup %2023  ;;  %v1848_v59 = vmul.f32 -1.442695, %v914_v57  ;;  %v1107_v37 = vadd.f32 %v2022_v42, %v1106_v31 }
 0x197   : > { %v2026_v60 = vpop.eup %2025  ;;  %v2597_v61 = vadd.f32 1.0, %v2024_v58 }
 0x198   : > { %2027 = vpow2.f32 %v1848_v59  ;;  %v1119_v62 = vmul.f32 %v2026_v60, %v976_v44  ;;  %vm1124_vm0 = vweird.f32 %v2026_v60  ;;  %v1111_v46 = vsel %vm2603_vm1, %v2022_v42, %v1107_v37 }
 0x199   : > { %2029 = vrcp.f32 %v2597_v61  ;;  %vm1125_vm5 = vmor %vm1123_vm2, %vm1124_vm0  ;;  %v1116_v16 = vsel %vm1113_vm4, %v1115_v12, %v1111_v46  ;;  %vm1138_vm8 = vweird.f32 %v2597_v61  ;;  %v1142_v33 = vand.u32 2147483647, %v2597_v61 }
 0x19a   : > { %v1120_v63 = vsub.f32 1.0, %v1119_v62  ;;  %v1144_v35 = vand.u32 2147483648, %v2597_v61 }
 0x19b   : > { %vm1143_vm13 = vcmp.eq.f32.partialorder %v1142_v33, 8.507059e+37 }
 0x19c   : > { %v1121_v3 = vmul.f32 %v2026_v60, %v1120_v63  ;;  %v1145_v49 = vor.u32 1.1754944e-38, %v1144_v35 }
 0x19e   : > { %v2028_v6 = vpop.eup %2027  ;;  %v1122_v4 = vadd.f32 %v2026_v60, %v1121_v3 }
 0x19f   : > { %v2030_v54 = vpop.eup %2029  ;;  %v978_v9 = vadd.f32 1.0, %v2028_v6  ;;  %v889_v11 = vpop.f32.mrf.mxu3 }
 0x1a0   : > { %v890_v14 = vadd.f32 %v889_v11, %v2576_v20  ;;  %v1126_v8 = vsel %vm1125_vm5, %v2026_v60, %v1122_v4  ;;  %v1134_v15 = vmul.f32 %v2030_v54, %v2597_v61  ;;  %vm1139_vm7 = vweird.f32 %v2030_v54  ;;  %v804_v60 = vpop.permute.xlu0 %803 }
 0x1a1   : > { %2031 = vrcp.f32 %v978_v9  ;;  %v1131_v38 = vsel %vm1128_vm6, %v1130_v13, %v1126_v8  ;;  %v1159_v10 = vand.u32 2147483648, %v978_v9  ;;  %v1157_v43 = vand.u32 2147483647, %v978_v9  ;;  %vm2617_vm10 = vmor %vm1138_vm8, %vm1139_vm7 }
 0x1a2   : > { %v915_v17 = vadd.f32 %v2498_v7, %v890_v14  ;;  %v1227_v18 = vpack.c.bf16 %v1131_v38, %v1116_v16  ;;  %v1135_v19 = vsub.f32 1.0, %v1134_v15  ;;  %vm1153_vm11 = vweird.f32 %v978_v9 }
 0x1a3   : > { %v1160_v41 = vor.u32 1.1754944e-38, %v1159_v10  ;;  %vm1158_vm14 = vcmp.eq.f32.partialorder %v1157_v43, 8.507059e+37 }
 0x1a4   : > { %v1849_v22 = vmul.f32 -1.442695, %v915_v17  ;;  %1869 = vmatmul.msk.bf16.gmra.mxu2 %vm821_vm12, %v1227_v18  ;;  %v1136_v25 = vmul.f32 %v2030_v54, %v1135_v19 }
 0x1a6   : > { %2033 = vpow2.f32 %v1849_v22  ;;  %v1137_v30 = vadd.f32 %v2030_v54, %v1136_v25 }
 0x1a7   : > { %v2032_v26 = vpop.eup %2031  ;;  %v891_v27 = vpop.f32.mrf.mxu3 }
 0x1a8   : > { %v892_v20 = vadd.f32 %v891_v27, %v800_v23  ;;  %v1149_v28 = vmul.f32 %v2032_v26, %v978_v9  ;;  %vm1154_vm9 = vweird.f32 %v2032_v26  ;;  %v1141_v42 = vsel %vm2617_vm10, %v2030_v54, %v1137_v30 }
 0x1a9   : > { %vm1155_vm3 = vmor %vm1153_vm11, %vm1154_vm9  ;;  %v1146_v52 = vsel %vm1143_vm13, %v1145_v49, %v1141_v42  ;;  %v1260_v49 = vpop.permute.xlu1 %1259 }
 0x1aa   : > { %v916_v29 = vadd.f32 %v2498_v7, %v892_v20  ;;  %v1150_v32 = vsub.f32 1.0, %v1149_v28 }
 0x1ac   : > { %v2034_v48 = vpop.eup %2033  ;;  %v1850_v36 = vmul.f32 -1.442695, %v916_v29  ;;  %v1151_v56 = vmul.f32 %v2032_v26, %v1150_v32 }
 0x1ad   : > { %v979_v39 = vadd.f32 1.0, %v2034_v48 }
 0x1ae   : > { %2035 = vpow2.f32 %v1850_v36  ;;  %v1152_v44 = vadd.f32 %v2032_v26, %v1151_v56 }
 0x1af   : > { %2037 = vrcp.f32 %v979_v39  ;;  %v894_v47 = vpop.f32.mrf.mxu3  ;;  %vm1168_vm0 = vweird.f32 %v979_v39  ;;  %v1174_v4 = vand.u32 2147483648, %v979_v39  ;;  %v1172_v11 = vand.u32 2147483647, %v979_v39 }
 0x1b0   : > { %v895_v50 = vadd.f32 %v894_v47, %v802_v45  ;;  %v1156_v51 = vsel %vm1155_vm3, %v2032_v26, %v1152_v44  ;;  %v2634_v47 = vld [vmem:[#allocation2] ss:$0 sm:$0xff] }
 0x1b1   : > { %v1161_v53 = vsel %vm1158_vm14, %v1160_v41, %v1156_v51  ;;  %v1175_v38 = vor.u32 1.1754944e-38, %v1174_v4  ;;  %vm1173_vm6 = vcmp.eq.f32.partialorder %v1172_v11, 8.507059e+37 }
 0x1b2   : > { %v917_v34 = vadd.f32 %v2498_v7, %v895_v50  ;;  %v1228_v2 = vpack.c.bf16 %v1161_v53, %v1146_v52  ;;  %v1262_v53 = vpop.permute.xlu2 %1261 }
 0x1b4   : > { %v2036_v55 = vpop.eup %2035  ;;  %v1851_v57 = vmul.f32 -1.442695, %v917_v34  ;;  %1870 = vmatmul.msk.bf16.gmra.mxu2 %vm821_vm12, %v1228_v2 }
 0x1b5   : > { %v2038_v58 = vpop.eup %2037  ;;  %v980_v59 = vadd.f32 1.0, %v2036_v55 }
 0x1b6   : > { %v1164_v31 = vmul.f32 %v2038_v58, %v979_v39  ;;  %2039 = vpow2.f32 %v1851_v57  ;;  %vm1169_vm15 = vweird.f32 %v2038_v58 }
 0x1b7   : > { %2041 = vrcp.f32 %v980_v59  ;;  %v896_v61 = vpop.f32.mrf.mxu3  ;;  %v1189_v54 = vand.u32 2147483648, %v980_v59  ;;  %v1187_v12 = vand.u32 2147483647, %v980_v59  ;;  %vm2626_vm2 = vmor %vm1168_vm0, %vm1169_vm15  ;;  %vm1183_vm4 = vweird.f32 %v980_v59 }
 0x1b8   : > { %v1165_v62 = vsub.f32 1.0, %v1164_v31  ;;  %v897_v37 = vadd.f32 %v896_v61, %v804_v60  ;;  %v1264_v31 = vpop.permute.xlu0 %1263 }
 0x1b9   : > { %v1190_v17 = vor.u32 1.1754944e-38, %v1189_v54  ;;  %vm1188_vm7 = vcmp.eq.f32.partialorder %v1187_v12, 8.507059e+37 }
 0x1ba   : > { %v918_v63 = vadd.f32 %v2498_v7, %v897_v37  ;;  %v1166_v0 = vmul.f32 %v2038_v58, %v1165_v62 }
 0x1bc   : > { %v2040_v24 = vpop.eup %2039  ;;  %v1852_v1 = vmul.f32 -1.442695, %v918_v63  ;;  %v1167_v46 = vadd.f32 %v2038_v58, %v1166_v0 }
 0x1bd   : > { %v2042_v3 = vpop.eup %2041  ;;  %v981_v5 = vadd.f32 1.0, %v2040_v24 }
 0x1be   : > { %v1179_v21 = vmul.f32 %v2042_v3, %v980_v59  ;;  %2043 = vpow2.f32 %v1852_v1  ;;  %vm1184_vm1 = vweird.f32 %v2042_v3  ;;  %v1171_v14 = vsel %vm2626_vm2, %v2038_v58, %v1167_v46 }
 0x1bf   : > { %2045 = vrcp.f32 %v981_v5  ;;  %vm1185_vm5 = vmor %vm1183_vm4, %vm1184_vm1  ;;  %v1176_v22 = vsel %vm1173_vm6, %v1175_v38, %v1171_v14  ;;  %vm1198_vm9 = vweird.f32 %v981_v5  ;;  %v1204_v32 = vand.u32 2147483648, %v981_v5  ;;  %v1268_v38 = vpop.permute.xlu2 %1267 }
 0x1c0   : > { %v1180_v6 = vsub.f32 1.0, %v1179_v21  ;;  %v1202_v35 = vand.u32 2147483647, %v981_v5  ;;  %vm1707_vm2 = vcmask 7168  }
 0x1c1   : > { %v1205_v43 = vor.u32 1.1754944e-38, %v1204_v32 }
 0x1c2   : > { %v1181_v9 = vmul.f32 %v2042_v3, %v1180_v6  ;;  %vm1203_vm14 = vcmp.eq.f32.partialorder %v1202_v35, 8.507059e+37 }
 0x1c4   : > { %v2044_v13 = vpop.eup %2043  ;;  %v1182_v8 = vadd.f32 %v2042_v3, %v1181_v9 }
 0x1c5   : > { %v2046_v15 = vpop.eup %2045  ;;  %v982_v16 = vadd.f32 1.0, %v2044_v13 }
 0x1c6   : > { %v1186_v18 = vsel %vm1185_vm5, %v2042_v3, %v1182_v8  ;;  %v1194_v19 = vmul.f32 %v2046_v15, %v981_v5  ;;  %vm1199_vm8 = vweird.f32 %v2046_v15  ;;  %v1266_v3 = vpop.permute.xlu1 %1265 }
 0x1c7   : > { %2047 = vrcp.f32 %v982_v16  ;;  %v1191_v23 = vsel %vm1188_vm7, %v1190_v17, %v1186_v18  ;;  %v1219_v33 = vand.u32 2147483648, %v982_v16  ;;  %v1217_v48 = vand.u32 2147483647, %v982_v16  ;;  %vm1200_vm11 = vmor %vm1198_vm9, %vm1199_vm8 }
 0x1c8   : > { %v1229_v25 = vpack.c.bf16 %v1191_v23, %v1176_v22  ;;  %v1195_v26 = vsub.f32 1.0, %v1194_v19  ;;  %vm1213_vm3 = vweird.f32 %v982_v16 }
 0x1c9   : > { %v1220_v39 = vor.u32 1.1754944e-38, %v1219_v33  ;;  %vm1218_vm15 = vcmp.eq.f32.partialorder %v1217_v48, 8.507059e+37  ;;  %v1270_v48 = vpop.permute.xlu0 %1269 }
 0x1ca   : > { %1871 = vmatmul.msk.bf16.vlgmr.msra.gmra.mxu3 %vm821_vm12, %v1229_v25  ;;  %v1196_v27 = vmul.f32 %v2046_v15, %v1195_v26 }
 0x1cc   : > { %v1197_v29 = vadd.f32 %v2046_v15, %v1196_v27 }
 0x1cd   : > { %v2048_v20 = vpop.eup %2047 }
 0x1ce   : > { %v1209_v28 = vmul.f32 %v2048_v20, %v982_v16  ;;  %vm1214_vm10 = vweird.f32 %v2048_v20  ;;  %v1201_v36 = vsel %vm1200_vm11, %v2046_v15, %v1197_v29 }
 0x1cf   : > { %vm1215_vm13 = vmor %vm1213_vm3, %vm1214_vm10  ;;  %v1206_v42 = vsel %vm1203_vm14, %v1205_v43, %v1201_v36 }
 0x1d0   : > { %v1210_v30 = vsub.f32 1.0, %v1209_v28 }
 0x1d2   : > { %v1211_v10 = vmul.f32 %v2048_v20, %v1210_v30 }
 0x1d4   : > { %v1212_v56 = vadd.f32 %v2048_v20, %v1211_v10 }
 0x1d6   : > { %v1216_v40 = vsel %vm1215_vm13, %v2048_v20, %v1212_v56 }
 0x1d7   : > { %v1221_v44 = vsel %vm1218_vm15, %v1220_v39, %v1216_v40 }
 0x1d8   : > { %v1230_v45 = vpack.c.bf16 %v1221_v44, %v1206_v42 }
 0x1da   : > { %1872 = vmatmul.msk.bf16.gmra.mxu3 %vm821_vm12, %v1230_v45 }
 0x1e7   : > { %v1343_v41 = vpop.f32.mrf.mxu2 }
 0x1e8   : > { %v1344_v50 = vadd.f32 %v1343_v41, %v1260_v49 }
 0x1ea   : > { %v1387_v51 = vadd.f32 %v2634_v47, %v1344_v50 }
 0x1ec   : > { %v1873_v52 = vmul.f32 -1.442695, %v1387_v51 }
 0x1ee   : > { %2049 = vpow2.f32 %v1873_v52 }
 0x1ef   : > { %v1345_v34 = vpop.f32.mrf.mxu2 }
 0x1f0   : > { %v1346_v2 = vadd.f32 %v1345_v34, %v1262_v53 }
 0x1f2   : > { %v1388_v55 = vadd.f32 %v2634_v47, %v1346_v2 }
 0x1f4   : > { %v2050_v57 = vpop.eup %2049  ;;  %v1874_v58 = vmul.f32 -1.442695, %v1388_v55  ;;  %v1272_v55 = vpop.permute.xlu1 %1271 }
 0x1f5   : > { %v1451_v59 = vadd.f32 1.0, %v2050_v57 }
 0x1f6   : > { %2051 = vpow2.f32 %v1874_v58 }
 0x1f7   : > { %2053 = vrcp.f32 %v1451_v59  ;;  %v1348_v60 = vpop.f32.mrf.mxu2  ;;  %v1478_v46 = vand.u32 2147483648, %v1451_v59  ;;  %v1476_v54 = vand.u32 2147483647, %v1451_v59  ;;  %vm1472_vm0 = vweird.f32 %v1451_v59 }
 0x1f8   : > { %v1349_v61 = vadd.f32 %v1348_v60, %v1264_v31 }
 0x1f9   : > { %v1479_v14 = vor.u32 1.1754944e-38, %v1478_v46  ;;  %vm1477_vm4 = vcmp.eq.f32.partialorder %v1476_v54, 8.507059e+37  ;;  %v1274_v46 = vpop.permute.xlu2 %1273 }
 0x1fa   : > { %v1389_v62 = vadd.f32 %v2634_v47, %v1349_v61 }
 0x1fc   : > { %v2052_v37 = vpop.eup %2051  ;;  %v1875_v63 = vmul.f32 -1.442695, %v1389_v62 }
 0x1fd   : > { %v2054_v24 = vpop.eup %2053  ;;  %v1452_v0 = vadd.f32 1.0, %v2052_v37 }
 0x1fe   : > { %v1468_v1 = vmul.f32 %v2054_v24, %v1451_v59  ;;  %2055 = vpow2.f32 %v1875_v63  ;;  %vm1473_vm12 = vweird.f32 %v2054_v24 }
 0x1ff   : > { %2057 = vrcp.f32 %v1452_v0  ;;  %v1350_v5 = vpop.f32.mrf.mxu2  ;;  %vm1474_vm1 = vmor %vm1472_vm0, %vm1473_vm12  ;;  %v1493_v23 = vand.u32 2147483648, %v1452_v0  ;;  %v1491_v26 = vand.u32 2147483647, %v1452_v0  ;;  %vm1487_vm6 = vweird.f32 %v1452_v0 }
 0x200   : > { %v1469_v21 = vsub.f32 1.0, %v1468_v1  ;;  %v1351_v6 = vadd.f32 %v1350_v5, %v1266_v3 }
 0x201   : > { %v1494_v32 = vor.u32 1.1754944e-38, %v1493_v23  ;;  %vm1492_vm8 = vcmp.eq.f32.partialorder %v1491_v26, 8.507059e+37  ;;  %v1276_v23 = vpop.permute.xlu0 %1275 }
 0x202   : > { %v1470_v4 = vmul.f32 %v2054_v24, %v1469_v21  ;;  %v1390_v9 = vadd.f32 %v2634_v47, %v1351_v6 }
 0x204   : > { %v2056_v11 = vpop.eup %2055  ;;  %v1471_v12 = vadd.f32 %v2054_v24, %v1470_v4  ;;  %v1876_v7 = vmul.f32 -1.442695, %v1390_v9 }
 0x205   : > { %v2058_v13 = vpop.eup %2057  ;;  %v1453_v8 = vadd.f32 1.0, %v2056_v11 }
 0x206   : > { %v1475_v15 = vsel %vm1474_vm1, %v2054_v24, %v1471_v12  ;;  %v1483_v16 = vmul.f32 %v2058_v13, %v1452_v0  ;;  %2059 = vpow2.f32 %v1876_v7  ;;  %vm1488_vm5 = vweird.f32 %v2058_v13 }
 0x207   : > { %v1480_v17 = vsel %vm1477_vm4, %v1479_v14, %v1475_v15  ;;  %2061 = vrcp.f32 %v1453_v8  ;;  %v1353_v18 = vpop.f32.mrf.mxu2  ;;  %vm1489_vm7 = vmor %vm1487_vm6, %vm1488_vm5  ;;  %v1508_v40 = vand.u32 2147483648, %v1453_v8  ;;  %v1506_v44 = vand.u32 2147483647, %v1453_v8 }
 0x208   : > { %1708 = vst.msk [vmem:[%s2645_s16] sm:$0xff] %vm1707_vm2, %v1480_v17  ;;  %v1484_v19 = vsub.f32 1.0, %v1483_v16  ;;  %v1354_v22 = vadd.f32 %v1353_v18, %v1268_v38  ;;  %vm1502_vm10 = vweird.f32 %v1453_v8 }
 0x209   : > { %v1509_v52 = vor.u32 1.1754944e-38, %v1508_v40  ;;  %vm1507_vm3 = vcmp.eq.f32.partialorder %v1506_v44, 8.507059e+37  ;;  %v1278_v40 = vpop.permute.xlu1 %1277 }
 0x20a   : > { %v1485_v25 = vmul.f32 %v2058_v13, %v1484_v19  ;;  %v1391_v27 = vadd.f32 %v2634_v47, %v1354_v22 }
 0x20c   : > { %v2060_v20 = vpop.eup %2059  ;;  %v1486_v28 = vadd.f32 %v2058_v13, %v1485_v25  ;;  %v1877_v29 = vmul.f32 -1.442695, %v1391_v27 }
 0x20d   : > { %v2062_v30 = vpop.eup %2061  ;;  %v1454_v33 = vadd.f32 1.0, %v2060_v20 }
 0x20e   : > { %v1490_v35 = vsel %vm1489_vm7, %v2058_v13, %v1486_v28  ;;  %v1498_v10 = vmul.f32 %v2062_v30, %v1453_v8  ;;  %2063 = vpow2.f32 %v1877_v29  ;;  %vm1503_vm9 = vweird.f32 %v2062_v30 }
 0x20f   : > { %v1495_v36 = vsel %vm1492_vm8, %v1494_v32, %v1490_v35  ;;  %2065 = vrcp.f32 %v1454_v33  ;;  %v1355_v56 = vpop.f32.mrf.mxu2  ;;  %vm1504_vm11 = vmor %vm1502_vm10, %vm1503_vm9  ;;  %v1523_v60 = vand.u32 2147483648, %v1454_v33  ;;  %v1521_v62 = vand.u32 2147483647, %v1454_v33 }
 0x210   : > { %1709 = vst.msk [vmem:[%s2645_s16 + $0x8] sm:$0xff] %vm1707_vm2, %v1495_v36  ;;  %v1499_v43 = vsub.f32 1.0, %v1498_v10  ;;  %v1356_v39 = vadd.f32 %v1355_v56, %v1270_v48  ;;  %vm1517_vm14 = vweird.f32 %v1454_v33 }
 0x211   : > { %v1524_v3 = vor.u32 1.1754944e-38, %v1523_v60  ;;  %vm1522_vm12 = vcmp.eq.f32.partialorder %v1521_v62, 8.507059e+37  ;;  %v1280_v60 = vpop.permute.xlu2 %1279 }
 0x212   : > { %v1500_v42 = vmul.f32 %v2062_v30, %v1499_v43  ;;  %v1392_v45 = vadd.f32 %v2634_v47, %v1356_v39 }
 0x214   : > { %v2064_v49 = vpop.eup %2063  ;;  %v1501_v41 = vadd.f32 %v2062_v30, %v1500_v42  ;;  %v1878_v50 = vmul.f32 -1.442695, %v1392_v45 }
 0x215   : > { %v2066_v51 = vpop.eup %2065  ;;  %v1455_v53 = vadd.f32 1.0, %v2064_v49 }
 0x216   : > { %v1505_v34 = vsel %vm1504_vm11, %v2062_v30, %v1501_v41  ;;  %v1513_v2 = vmul.f32 %v2066_v51, %v1454_v33  ;;  %2067 = vpow2.f32 %v1878_v50  ;;  %vm1518_vm13 = vweird.f32 %v2066_v51 }
 0x217   : > { %v1510_v57 = vsel %vm1507_vm3, %v1509_v52, %v1505_v34  ;;  %2069 = vrcp.f32 %v1455_v53  ;;  %v1358_v58 = vpop.f32.mrf.mxu2  ;;  %vm1519_vm15 = vmor %vm1517_vm14, %vm1518_vm13  ;;  %v1538_v12 = vand.u32 2147483648, %v1455_v53  ;;  %v1536_v13 = vand.u32 2147483647, %v1455_v53 }
 0x218   : > { %1710 = vst.msk [vmem:[%s2645_s16 + $0x10] sm:$0xff] %vm1707_vm2, %v1510_v57  ;;  %v1514_v59 = vsub.f32 1.0, %v1513_v2  ;;  %v1359_v31 = vadd.f32 %v1358_v58, %v1272_v55  ;;  %vm1532_vm1 = vweird.f32 %v1455_v53 }
 0x219   : > { %v1539_v17 = vor.u32 1.1754944e-38, %v1538_v12  ;;  %vm1537_vm5 = vcmp.eq.f32.partialorder %v1536_v13, 8.507059e+37  ;;  %v1282_v12 = vpop.permute.xlu0 %1281 }
 0x21a   : > { %v1515_v61 = vmul.f32 %v2066_v51, %v1514_v59  ;;  %v1393_v37 = vadd.f32 %v2634_v47, %v1359_v31 }
 0x21c   : > { %v2068_v63 = vpop.eup %2067  ;;  %v1516_v24 = vadd.f32 %v2066_v51, %v1515_v61  ;;  %v1879_v0 = vmul.f32 -1.442695, %v1393_v37 }
 0x21d   : > { %v2070_v1 = vpop.eup %2069  ;;  %v1456_v5 = vadd.f32 1.0, %v2068_v63 }
 0x21e   : > { %v1520_v21 = vsel %vm1519_vm15, %v2066_v51, %v1516_v24  ;;  %v1528_v6 = vmul.f32 %v2070_v1, %v1455_v53  ;;  %2071 = vpow2.f32 %v1879_v0  ;;  %vm1533_vm0 = vweird.f32 %v2070_v1 }
 0x21f   : > { %v1525_v4 = vsel %vm1522_vm12, %v1524_v3, %v1520_v21  ;;  %2073 = vrcp.f32 %v1456_v5  ;;  %v1360_v54 = vpop.f32.mrf.mxu2  ;;  %vm1534_vm4 = vmor %vm1532_vm1, %vm1533_vm0  ;;  %v1553_v28 = vand.u32 2147483648, %v1456_v5  ;;  %v1551_v30 = vand.u32 2147483647, %v1456_v5 }
 0x220   : > { %1711 = vst.msk [vmem:[%s2645_s16 + $0x18] sm:$0xff] %vm1707_vm2, %v1525_v4  ;;  %v1529_v9 = vsub.f32 1.0, %v1528_v6  ;;  %v1361_v11 = vadd.f32 %v1360_v54, %v1274_v46  ;;  %vm1547_vm7 = vweird.f32 %v1456_v5 }
 0x221   : > { %v1554_v36 = vor.u32 1.1754944e-38, %v1553_v28  ;;  %vm1552_vm9 = vcmp.eq.f32.partialorder %v1551_v30, 8.507059e+37 }
 0x222   : > { %v1530_v7 = vmul.f32 %v2070_v1, %v1529_v9  ;;  %v1394_v14 = vadd.f32 %v2634_v47, %v1361_v11 }
 0x224   : > { %v2072_v8 = vpop.eup %2071  ;;  %v1531_v15 = vadd.f32 %v2070_v1, %v1530_v7  ;;  %v1880_v16 = vmul.f32 -1.442695, %v1394_v14 }
 0x225   : > { %v2074_v38 = vpop.eup %2073  ;;  %v1457_v18 = vadd.f32 1.0, %v2072_v8 }
 0x226   : > { %v1535_v19 = vsel %vm1534_vm4, %v2070_v1, %v1531_v15  ;;  %v1543_v22 = vmul.f32 %v2074_v38, %v1456_v5  ;;  %2075 = vpow2.f32 %v1880_v16  ;;  %vm1548_vm6 = vweird.f32 %v2074_v38 }
 0x227   : > { %v1540_v25 = vsel %vm1537_vm5, %v1539_v17, %v1535_v19  ;;  %2077 = vrcp.f32 %v1457_v18  ;;  %v1363_v26 = vpop.f32.mrf.mxu2  ;;  %vm1549_vm8 = vmor %vm1547_vm7, %vm1548_vm6  ;;  %v1568_v41 = vand.u32 2147483648, %v1457_v18  ;;  %v1566_v51 = vand.u32 2147483647, %v1457_v18 }
 0x228   : > { %1712 = vst.msk [vmem:[%s2645_s16 + $0x20] sm:$0xff] %vm1707_vm2, %v1540_v25  ;;  %v1544_v27 = vsub.f32 1.0, %v1543_v22  ;;  %v1364_v20 = vadd.f32 %v1363_v26, %v1276_v23  ;;  %vm1562_vm11 = vweird.f32 %v1457_v18 }
 0x229   : > { %v1569_v57 = vor.u32 1.1754944e-38, %v1568_v41  ;;  %vm1567_vm13 = vcmp.eq.f32.partialorder %v1566_v51, 8.507059e+37 }
 0x22a   : > { %v1545_v29 = vmul.f32 %v2074_v38, %v1544_v27  ;;  %v1395_v32 = vadd.f32 %v2634_v47, %v1364_v20 }
 0x22c   : > { %v2076_v33 = vpop.eup %2075  ;;  %v1546_v35 = vadd.f32 %v2074_v38, %v1545_v29  ;;  %v1881_v10 = vmul.f32 -1.442695, %v1395_v32 }
 0x22d   : > { %v2078_v48 = vpop.eup %2077  ;;  %v1458_v56 = vadd.f32 1.0, %v2076_v33 }
 0x22e   : > { %v1550_v43 = vsel %vm1549_vm8, %v2074_v38, %v1546_v35  ;;  %v1558_v39 = vmul.f32 %v2078_v48, %v1457_v18  ;;  %2079 = vpow2.f32 %v1881_v10  ;;  %vm1563_vm10 = vweird.f32 %v2078_v48 }
 0x22f   : > { %v1555_v42 = vsel %vm1552_vm9, %v1554_v36, %v1550_v43  ;;  %2081 = vrcp.f32 %v1458_v56  ;;  %v1365_v44 = vpop.f32.mrf.mxu2  ;;  %vm1564_vm3 = vmor %vm1562_vm11, %vm1563_vm10  ;;  %v1583_v24 = vand.u32 2147483648, %v1458_v56  ;;  %v1581_v1 = vand.u32 2147483647, %v1458_v56  ;;  %v1284_v36 = vpop.permute.xlu1 %1283 }
 0x230   : > { %1713 = vst.msk [vmem:[%s2645_s16 + $0x28] sm:$0xff] %vm1707_vm2, %v1555_v42  ;;  %v1559_v45 = vsub.f32 1.0, %v1558_v39  ;;  %v1366_v49 = vadd.f32 %v1365_v44, %v1278_v40  ;;  %vm1577_vm15 = vweird.f32 %v1458_v56 }
 0x231   : > { %v1584_v4 = vor.u32 1.1754944e-38, %v1583_v24  ;;  %vm1582_vm0 = vcmp.eq.f32.partialorder %v1581_v1, 8.507059e+37 }
 0x232   : > { %v1560_v50 = vmul.f32 %v2078_v48, %v1559_v45  ;;  %v1396_v52 = vadd.f32 %v2634_v47, %v1366_v49 }
 0x234   : > { %v2080_v53 = vpop.eup %2079  ;;  %v1561_v34 = vadd.f32 %v2078_v48, %v1560_v50  ;;  %v1882_v2 = vmul.f32 -1.442695, %v1396_v52 }
 0x235   : > { %v2082_v55 = vpop.eup %2081  ;;  %v1459_v58 = vadd.f32 1.0, %v2080_v53 }
 0x236   : > { %v1565_v59 = vsel %vm1564_vm3, %v2078_v48, %v1561_v34  ;;  %v1573_v31 = vmul.f32 %v2082_v55, %v1458_v56  ;;  %2083 = vpow2.f32 %v1882_v2  ;;  %vm1578_vm14 = vweird.f32 %v2082_v55 }
 0x237   : > { %v1570_v61 = vsel %vm1567_vm13, %v1569_v57, %v1565_v59  ;;  %2085 = vrcp.f32 %v1459_v58  ;;  %v1368_v62 = vpop.f32.mrf.mxu2  ;;  %vm1579_vm12 = vmor %vm1577_vm15, %vm1578_vm14  ;;  %v1598_v15 = vand.u32 2147483648, %v1459_v58  ;;  %v1596_v38 = vand.u32 2147483647, %v1459_v58 }
 0x238   : > { %1714 = vst.msk [vmem:[%s2645_s16 + $0x30] sm:$0xff] %vm1707_vm2, %v1570_v61  ;;  %v1574_v37 = vsub.f32 1.0, %v1573_v31  ;;  %v1369_v63 = vadd.f32 %v1368_v62, %v1280_v60  ;;  %vm1592_vm4 = vweird.f32 %v1459_v58 }
 0x239   : > { %v1599_v25 = vor.u32 1.1754944e-38, %v1598_v15  ;;  %vm1597_vm6 = vcmp.eq.f32.partialorder %v1596_v38, 8.507059e+37 }
 0x23a   : > { %v1575_v0 = vmul.f32 %v2082_v55, %v1574_v37  ;;  %v1397_v3 = vadd.f32 %v2634_v47, %v1369_v63 }
 0x23c   : > { %v2084_v5 = vpop.eup %2083  ;;  %v1576_v21 = vadd.f32 %v2082_v55, %v1575_v0  ;;  %v1883_v6 = vmul.f32 -1.442695, %v1397_v3 }
 0x23d   : > { %v2086_v46 = vpop.eup %2085  ;;  %v1460_v54 = vadd.f32 1.0, %v2084_v5 }
 0x23e   : > { %v1580_v9 = vsel %vm1579_vm12, %v2082_v55, %v1576_v21  ;;  %v1588_v11 = vmul.f32 %v2086_v46, %v1459_v58  ;;  %2087 = vpow2.f32 %v1883_v6  ;;  %vm1593_vm1 = vweird.f32 %v2086_v46  ;;  %v1286_v55 = vpop.permute.xlu2 %1285  ;;  %v1288_v6 = vpop.permute.xlu0 %1287 }
 0x23f   : > { %v1585_v7 = vsel %vm1582_vm0, %v1584_v4, %v1580_v9  ;;  %2089 = vrcp.f32 %v1460_v54  ;;  %v1370_v13 = vpop.f32.mrf.mxu2  ;;  %vm1594_vm5 = vmor %vm1592_vm4, %vm1593_vm1  ;;  %v1613_v30 = vand.u32 2147483648, %v1460_v54  ;;  %v1611_v33 = vand.u32 2147483647, %v1460_v54 }
 0x240   : > { %1715 = vst.msk [vmem:[%s2645_s16 + $0x38] sm:$0xff] %vm1707_vm2, %v1585_v7  ;;  %v1589_v14 = vsub.f32 1.0, %v1588_v11  ;;  %v1371_v8 = vadd.f32 %v1370_v13, %v1282_v12  ;;  %vm1607_vm8 = vweird.f32 %v1460_v54 }
 0x241   : > { %v1614_v56 = vor.u32 1.1754944e-38, %v1613_v30  ;;  %vm1612_vm10 = vcmp.eq.f32.partialorder %v1611_v33, 8.507059e+37 }
 0x242   : > { %v1590_v16 = vmul.f32 %v2086_v46, %v1589_v14  ;;  %v1398_v17 = vadd.f32 %v2634_v47, %v1371_v8 }
 0x244   : > { %v2088_v18 = vpop.eup %2087  ;;  %v1591_v19 = vadd.f32 %v2086_v46, %v1590_v16  ;;  %v1884_v22 = vmul.f32 -1.442695, %v1398_v17  ;;  %v1290_v16 = vpop.permute.xlu1 %1289 }
 0x245   : > { %v2090_v23 = vpop.eup %2089  ;;  %v1461_v26 = vadd.f32 1.0, %v2088_v18 }
 0x246   : > { %v1595_v27 = vsel %vm1594_vm5, %v2086_v46, %v1591_v19  ;;  %v1603_v20 = vmul.f32 %v2090_v23, %v1460_v54  ;;  %2091 = vpow2.f32 %v1884_v22  ;;  %vm1608_vm7 = vweird.f32 %v2090_v23 }
 0x247   : > { %v1600_v28 = vsel %vm1597_vm6, %v1599_v25, %v1595_v27  ;;  %2093 = vrcp.f32 %v1461_v26  ;;  %vm1609_vm9 = vmor %vm1607_vm8, %vm1608_vm7  ;;  %v1628_v50 = vand.u32 2147483648, %v1461_v26  ;;  %v1626_v52 = vand.u32 2147483647, %v1461_v26 }
 0x248   : > { %1716 = vst.msk [vmem:[%s2645_s16 + $0x40] sm:$0xff] %vm1707_vm2, %v1600_v28  ;;  %v1604_v29 = vsub.f32 1.0, %v1603_v20  ;;  %vm1622_vm3 = vweird.f32 %v1461_v26 }
 0x249   : > { %v1629_v57 = vor.u32 1.1754944e-38, %v1628_v50  ;;  %vm1627_vm14 = vcmp.eq.f32.partialorder %v1626_v52, 8.507059e+37 }
 0x24a   : > { %v1605_v32 = vmul.f32 %v2090_v23, %v1604_v29 }
 0x24c   : > { %v2092_v35 = vpop.eup %2091  ;;  %v1606_v10 = vadd.f32 %v2090_v23, %v1605_v32 }
 0x24d   : > { %v2094_v48 = vpop.eup %2093  ;;  %v1462_v43 = vadd.f32 1.0, %v2092_v35  ;;  %v1373_v39 = vpop.f32.mrf.mxu3 }
 0x24e   : > { %v1610_v40 = vsel %vm1609_vm9, %v2090_v23, %v1606_v10  ;;  %v1618_v42 = vmul.f32 %v2094_v48, %v1461_v26  ;;  %v1374_v44 = vadd.f32 %v1373_v39, %v1284_v36  ;;  %vm1623_vm11 = vweird.f32 %v2094_v48 }
 0x24f   : > { %v1615_v45 = vsel %vm1612_vm10, %v1614_v56, %v1610_v40  ;;  %2095 = vrcp.f32 %v1462_v43  ;;  %vm1624_vm13 = vmor %vm1622_vm3, %vm1623_vm11  ;;  %v1643_v63 = vand.u32 2147483648, %v1462_v43  ;;  %v1641_v1 = vand.u32 2147483647, %v1462_v43 }
 0x250   : > { %1717 = vst.msk [vmem:[%s2645_s16 + $0x48] sm:$0xff] %vm1707_vm2, %v1615_v45  ;;  %v1619_v49 = vsub.f32 1.0, %v1618_v42  ;;  %v1399_v41 = vadd.f32 %v2634_v47, %v1374_v44  ;;  %vm1637_vm12 = vweird.f32 %v1462_v43 }
 0x251   : > { %v1644_v46 = vor.u32 1.1754944e-38, %v1643_v63  ;;  %vm1642_vm1 = vcmp.eq.f32.partialorder %v1641_v1, 8.507059e+37 }
 0x252   : > { %v1620_v51 = vmul.f32 %v2094_v48, %v1619_v49  ;;  %v1885_v53 = vmul.f32 -1.442695, %v1399_v41 }
 0x254   : > { %v1621_v34 = vadd.f32 %v2094_v48, %v1620_v51  ;;  %2097 = vpow2.f32 %v1885_v53 }
 0x255   : > { %v2096_v2 = vpop.eup %2095  ;;  %v1375_v58 = vpop.f32.mrf.mxu3 }
 0x256   : > { %v1625_v59 = vsel %vm1624_vm13, %v2094_v48, %v1621_v34  ;;  %v1633_v31 = vmul.f32 %v2096_v2, %v1462_v43  ;;  %v1376_v60 = vadd.f32 %v1375_v58, %v1286_v55  ;;  %vm1638_vm15 = vweird.f32 %v2096_v2 }
 0x257   : > { %v1630_v61 = vsel %vm1627_vm14, %v1629_v57, %v1625_v59  ;;  %vm1639_vm0 = vmor %vm1637_vm12, %vm1638_vm15 }
 0x258   : > { %1718 = vst.msk [vmem:[%s2645_s16 + $0x50] sm:$0xff] %vm1707_vm2, %v1630_v61  ;;  %v1634_v62 = vsub.f32 1.0, %v1633_v31  ;;  %v1400_v37 = vadd.f32 %v2634_v47, %v1376_v60 }
 0x25a   : > { %v2098_v24 = vpop.eup %2097  ;;  %v1635_v0 = vmul.f32 %v2096_v2, %v1634_v62  ;;  %v1886_v3 = vmul.f32 -1.442695, %v1400_v37 }
 0x25b   : > { %v1463_v5 = vadd.f32 1.0, %v2098_v24 }
 0x25c   : > { %v1636_v21 = vadd.f32 %v2096_v2, %v1635_v0  ;;  %2099 = vpow2.f32 %v1886_v3 }
 0x25d   : > { %2101 = vrcp.f32 %v1463_v5  ;;  %v1378_v4 = vpop.f32.mrf.mxu3  ;;  %v1658_v19 = vand.u32 2147483648, %v1463_v5  ;;  %v1656_v23 = vand.u32 2147483647, %v1463_v5  ;;  %vm1652_vm5 = vweird.f32 %v1463_v5 }
 0x25e   : > { %v1640_v54 = vsel %vm1639_vm0, %v2096_v2, %v1636_v21  ;;  %v1379_v9 = vadd.f32 %v1378_v4, %v1288_v6 }
 0x25f   : > { %v1645_v11 = vsel %vm1642_vm1, %v1644_v46, %v1640_v54  ;;  %v1659_v29 = vor.u32 1.1754944e-38, %v1658_v19  ;;  %vm1657_vm7 = vcmp.eq.f32.partialorder %v1656_v23, 8.507059e+37 }
 0x260   : > { %1719 = vst.msk [vmem:[%s2645_s16 + $0x58] sm:$0xff] %vm1707_vm2, %v1645_v11  ;;  %v1401_v12 = vadd.f32 %v2634_v47, %v1379_v9 }
 0x262   : > { %v2100_v7 = vpop.eup %2099  ;;  %v1887_v13 = vmul.f32 -1.442695, %v1401_v12 }
 0x263   : > { %v2102_v14 = vpop.eup %2101  ;;  %v1464_v8 = vadd.f32 1.0, %v2100_v7 }
 0x264   : > { %v1648_v15 = vmul.f32 %v2102_v14, %v1463_v5  ;;  %2103 = vpow2.f32 %v1887_v13  ;;  %vm1653_vm4 = vweird.f32 %v2102_v14 }
 0x265   : > { %2105 = vrcp.f32 %v1464_v8  ;;  %v1380_v38 = vpop.f32.mrf.mxu3  ;;  %vm1654_vm6 = vmor %vm1652_vm5, %vm1653_vm4  ;;  %v1673_v48 = vand.u32 2147483648, %v1464_v8  ;;  %v1671_v36 = vand.u32 2147483647, %v1464_v8  ;;  %vm1667_vm9 = vweird.f32 %v1464_v8 }
 0x266   : > { %v1649_v17 = vsub.f32 1.0, %v1648_v15  ;;  %v1381_v18 = vadd.f32 %v1380_v38, %v1290_v16 }
 0x267   : > { %v1674_v40 = vor.u32 1.1754944e-38, %v1673_v48  ;;  %vm1672_vm11 = vcmp.eq.f32.partialorder %v1671_v36, 8.507059e+37 }
 0x268   : > { %v1650_v22 = vmul.f32 %v2102_v14, %v1649_v17  ;;  %v1402_v25 = vadd.f32 %v2634_v47, %v1381_v18 }
 0x26a   : > { %v2104_v26 = vpop.eup %2103  ;;  %v1651_v27 = vadd.f32 %v2102_v14, %v1650_v22  ;;  %v1888_v20 = vmul.f32 -1.442695, %v1402_v25 }
 0x26b   : > { %v2106_v28 = vpop.eup %2105  ;;  %v1465_v30 = vadd.f32 1.0, %v2104_v26 }
 0x26c   : > { %v1655_v32 = vsel %vm1654_vm6, %v2102_v14, %v1651_v27  ;;  %v1663_v33 = vmul.f32 %v2106_v28, %v1464_v8  ;;  %2107 = vpow2.f32 %v1888_v20  ;;  %vm1668_vm8 = vweird.f32 %v2106_v28 }
 0x26d   : > { %v1660_v35 = vsel %vm1657_vm7, %v1659_v29, %v1655_v32  ;;  %2109 = vrcp.f32 %v1465_v30  ;;  %vm1669_vm10 = vmor %vm1667_vm9, %vm1668_vm8  ;;  %v1688_v50 = vand.u32 2147483648, %v1465_v30  ;;  %v1686_v52 = vand.u32 2147483647, %v1465_v30 }
 0x26e   : > { %1720 = vst.msk [vmem:[%s2645_s16 + $0x60] sm:$0xff] %vm1707_vm2, %v1660_v35  ;;  %v1664_v10 = vsub.f32 1.0, %v1663_v33  ;;  %vm1682_vm13 = vweird.f32 %v1465_v30 }
 0x26f   : > { %v1689_v2 = vor.u32 1.1754944e-38, %v1688_v50  ;;  %vm1687_vm15 = vcmp.eq.f32.partialorder %v1686_v52, 8.507059e+37 }
 0x270   : > { %v1665_v47 = vmul.f32 %v2106_v28, %v1664_v10 }
 0x272   : > { %v2108_v56 = vpop.eup %2107  ;;  %v1666_v43 = vadd.f32 %v2106_v28, %v1665_v47 }
 0x273   : > { %v2110_v39 = vpop.eup %2109  ;;  %v1466_v42 = vadd.f32 1.0, %v2108_v56 }
 0x274   : > { %v1670_v44 = vsel %vm1669_vm10, %v2106_v28, %v1666_v43  ;;  %v1678_v45 = vmul.f32 %v2110_v39, %v1465_v30  ;;  %vm1683_vm3 = vweird.f32 %v2110_v39 }
 0x275   : > { %v1675_v49 = vsel %vm1672_vm11, %v1674_v40, %v1670_v44  ;;  %2111 = vrcp.f32 %v1466_v42  ;;  %vm1684_vm14 = vmor %vm1682_vm13, %vm1683_vm3  ;;  %v1703_v31 = vand.u32 2147483648, %v1466_v42  ;;  %v1701_v61 = vand.u32 2147483647, %v1466_v42 }
 0x276   : > { %1721 = vst.msk [vmem:[%s2645_s16 + $0x68] sm:$0xff] %vm1707_vm2, %v1675_v49  ;;  %v1679_v41 = vsub.f32 1.0, %v1678_v45  ;;  %vm1697_vm0 = vweird.f32 %v1466_v42 }
 0x277   : > { %v1704_v37 = vor.u32 1.1754944e-38, %v1703_v31  ;;  %vm1702_vm4 = vcmp.eq.f32.partialorder %v1701_v61, 8.507059e+37 }
 0x278   : > { %v1680_v51 = vmul.f32 %v2110_v39, %v1679_v41 }
 0x27a   : > { %v1681_v53 = vadd.f32 %v2110_v39, %v1680_v51 }
 0x27b   : > { %v2112_v34 = vpop.eup %2111 }
 0x27c   : > { %v1685_v55 = vsel %vm1684_vm14, %v2110_v39, %v1681_v53  ;;  %v1693_v57 = vmul.f32 %v2112_v34, %v1466_v42  ;;  %vm1698_vm12 = vweird.f32 %v2112_v34 }
 0x27d   : > { %v1690_v58 = vsel %vm1687_vm15, %v1689_v2, %v1685_v55  ;;  %vm1699_vm1 = vmor %vm1697_vm0, %vm1698_vm12 }
 0x27e   : > { %1722 = vst.msk [vmem:[%s2645_s16 + $0x70] sm:$0xff] %vm1707_vm2, %v1690_v58  ;;  %v1694_v59 = vsub.f32 1.0, %v1693_v57 }
 0x280   : > { %v1695_v60 = vmul.f32 %v2112_v34, %v1694_v59 }
 0x282   : > { %v1696_v62 = vadd.f32 %v2112_v34, %v1695_v60 }
 0x284   : > { %v1700_v63 = vsel %vm1699_vm1, %v2112_v34, %v1696_v62 }
 0x285   : > { %v1705_v24 = vsel %vm1702_vm4, %v1704_v37, %v1700_v63 }
 0x286   : > { %1723 = vst.msk [vmem:[%s2645_s16 + $0x78] sm:$0xff] %vm1707_vm2, %v1705_v24 }
 0x287 PF: > { %s19_s26 = sadd.s32 1, %s2119_s26  }
 0x288   : > { %p16_p4 = scmp.ge.s32.totalorder %s19_s26, 5  }
 0x28a   :  { %18 = sbr.rel (!%p16_p4) target bundleno = 3 (0x3), region = 78 }

</bundles_post_ra>
